<compile_context>
chip_gen: v7x
topology: tpu7x:2x2x1
jax: 0.10.0
libtpu: 0.0.40
codegen_flags: <defaults>
</compile_context>

<pallas_src>
import math

import jax
import jax.numpy as jnp
from jax import lax
from jax.experimental import pallas as pl
from jax.experimental.pallas import tpu as pltpu


def word_bilstm_kernel(lens_ref, x_ref,
                       wih_ref, bih_ref,
                       whh_f_ref, whh_b_ref,
                       wproj_f_ref, wproj_b_ref, bproj_ref,
                       out_ref,
                       ginf_ref, ginb_ref, fwd_ref, bwd_ref):
    T, TB, E = x_ref.shape
    G = 4 * E

    x = x_ref[...].astype(jnp.float32)          # (T, TB, E) time-major
    lens = lens_ref[...]                        # (TB, 1) int32

    whh_f = whh_f_ref[...]                      # (E, 4E)
    whh_b = whh_b_ref[...]                      # (E, 4E)

    # ---- hoisted input projection for BOTH directions, biases folded in ----
    x_flat = x.reshape(T * TB, E)
    gin = (jnp.dot(x_flat, wih_ref[...], preferred_element_type=jnp.float32)
           + bih_ref[...])                      # (T*TB, 8E)
    gin = gin.reshape(T, TB, 2 * G)
    ginf_ref[...] = gin[:, :, :G]
    ginb_ref[...] = gin[:, :, G:]

    zeros = jnp.zeros((TB, E), jnp.float32)

    def cell(gates, c):
        i = jax.nn.sigmoid(gates[:, 0 * E:1 * E])
        f = jax.nn.sigmoid(gates[:, 1 * E:2 * E])
        g = jnp.tanh(gates[:, 2 * E:3 * E])
        o = jax.nn.sigmoid(gates[:, 3 * E:4 * E])
        c_new = f * c + i * g
        h_new = o * jnp.tanh(c_new)
        return h_new, c_new

    # ---- forward recurrence (freeze state & zero output for t >= lens) ----
    def fwd_body(t, carry):
        h, c = carry
        gates = ginf_ref[t] + jnp.dot(h, whh_f, preferred_element_type=jnp.float32)
        h_new, c_new = cell(gates, c)
        valid = t < lens                        # (TB, 1) bool
        fwd_ref[t] = jnp.where(valid, h_new, 0.0)
        return jnp.where(valid, h_new, h), jnp.where(valid, c_new, c)

    lax.fori_loop(0, T, fwd_body, (zeros, zeros), unroll=True)

    # ---- backward recurrence (starts at t = lens[b]-1 via masking) ----
    def bwd_body(s, carry):
        h, c = carry
        t = T - 1 - s
        gates = ginb_ref[t] + jnp.dot(h, whh_b, preferred_element_type=jnp.float32)
        h_new, c_new = cell(gates, c)
        valid = t < lens
        bwd_ref[t] = jnp.where(valid, h_new, 0.0)
        return jnp.where(valid, h_new, h), jnp.where(valid, c_new, c)

    lax.fori_loop(0, T, bwd_body, (zeros, zeros), unroll=True)

    # ---- fused projection over all timesteps + residual, single store ----
    # TODO(synk): nn.Dropout(0.2) is identity in eval mode; stochastic dropout not emitted.
    fwd_all = fwd_ref[...].reshape(T * TB, E)
    bwd_all = bwd_ref[...].reshape(T * TB, E)
    proj = (jnp.dot(fwd_all, wproj_f_ref[...], preferred_element_type=jnp.float32)
            + jnp.dot(bwd_all, wproj_b_ref[...], preferred_element_type=jnp.float32)
            + bproj_ref[...])                   # (T*TB, E)
    out_ref[...] = (proj.reshape(T, TB, E) + x).astype(out_ref.dtype)


def word_bilstm_forward(input_embeddings, lens, params, *, batch_block=None):
    """Equivalent of WordBiLSTM.forward((input_embeddings, lens)) in eval mode."""
    B, T, E = input_embeddings.shape
    G = 4 * E
    if batch_block is None:
        batch_block = B if B < 8 else 8
        if B % batch_block != 0:
            batch_block = B
    TB = batch_block
    nb = pl.cdiv(B, TB)

    lens2d = lens.astype(jnp.int32).reshape(B, 1)
    x_tm = jnp.transpose(input_embeddings.astype(jnp.float32), (1, 0, 2))  # (T, B, E)

    grid_spec = pltpu.PrefetchScalarGridSpec(
        num_scalar_prefetch=0,
        grid=(nb,),
        in_specs=[
            pl.BlockSpec((TB, 1), lambda i: (i, 0)),           # lens
            pl.BlockSpec((T, TB, E), lambda i: (0, i, 0)),     # x (time-major)
            pl.BlockSpec((E, 2 * G), lambda i: (0, 0)),        # W_ih (both dirs)
            pl.BlockSpec((1, 2 * G), lambda i: (0, 0)),        # biases (both dirs)
            pl.BlockSpec((E, G), lambda i: (0, 0)),            # W_hh fwd
            pl.BlockSpec((E, G), lambda i: (0, 0)),            # W_hh bwd
            pl.BlockSpec((E, E), lambda i: (0, 0)),            # W_proj (fwd half)
            pl.BlockSpec((E, E), lambda i: (0, 0)),            # W_proj (bwd half)
            pl.BlockSpec((1, E), lambda i: (0, 0)),            # b_proj
        ],
        out_specs=pl.BlockSpec((T, TB, E), lambda i: (0, i, 0)),
        scratch_shapes=[
            pltpu.VMEM((T, TB, G), jnp.float32),   # precomputed input gates, fwd
            pltpu.VMEM((T, TB, G), jnp.float32),   # precomputed input gates, bwd
            pltpu.VMEM((T, TB, E), jnp.float32),   # per-step fwd hidden states
            pltpu.VMEM((T, TB, E), jnp.float32),   # per-step bwd hidden states
        ],
    )

    out_tm = pl.pallas_call(
        word_bilstm_kernel,
        out_shape=jax.ShapeDtypeStruct((T, B, E), input_embeddings.dtype),
        grid_spec=grid_spec,
        compiler_params=pltpu.CompilerParams(
            dimension_semantics=("parallel",)),
    )(lens2d, x_tm,
      params["wih_cat"], params["b_cat"],
      params["whh_f"], params["whh_b"],
      params["wproj_f"], params["wproj_b"], params["bproj"])

    out = jnp.transpose(out_tm, (1, 0, 2))
    return out, lens


def init_params(key, E):
    """Deterministic synthetic init matching PyTorch parameter shapes/ranges."""
    k = jax.random.split(key, 10)
    bound_lstm = 1.0 / math.sqrt(E)
    bound_proj = 1.0 / math.sqrt(2 * E)
    u = lambda kk, shape, b: jax.random.uniform(kk, shape, jnp.float32, -b, b)
    # PyTorch shapes: weight_ih_l0 (4E, E), weight_hh_l0 (4E, E), biases (4E,)
    w_ih_f = u(k[0], (4 * E, E), bound_lstm)
    w_hh_f = u(k[1], (4 * E, E), bound_lstm)
    b_ih_f = u(k[2], (4 * E,), bound_lstm)
    b_hh_f = u(k[3], (4 * E,), bound_lstm)
    w_ih_b = u(k[4], (4 * E, E), bound_lstm)
    w_hh_b = u(k[5], (4 * E, E), bound_lstm)
    b_ih_b = u(k[6], (4 * E,), bound_lstm)
    b_hh_b = u(k[7], (4 * E,), bound_lstm)
    # projection_layer: Linear(2E -> E): weight (E, 2E), bias (E,)
    w_proj = u(k[8], (E, 2 * E), bound_proj)
    b_proj = u(k[9], (E,), bound_proj)

    w_proj_t = w_proj.T                                        # (2E, E)
    return dict(
        wih_cat=jnp.concatenate([w_ih_f.T, w_ih_b.T], axis=1),            # (E, 8E)
        b_cat=jnp.concatenate([b_ih_f + b_hh_f, b_ih_b + b_hh_b])[None],  # (1, 8E)
        whh_f=w_hh_f.T, whh_b=w_hh_b.T,                                   # (E, 4E)
        wproj_f=w_proj_t[:E, :], wproj_b=w_proj_t[E:, :],                 # (E, E)
        bproj=b_proj[None, :],                                            # (1, E)
    )


if __name__ == "__main__":
    key = jax.random.PRNGKey(0)
    kx, kp = jax.random.split(key)

    B, T, E = 2, 8, 32                     # batch=2, seq=8, wordEmbeddingSize=32
    x = jax.random.normal(kx, (B, T, E), jnp.float32)
    lens = jnp.array([8, 5], jnp.int32)    # max(lens) == T (required for residual)
    params = init_params(kp, E)

    out, out_lens = word_bilstm_forward(x, lens, params)
    jax.block_until_ready(out)
    assert out.shape == (B, T, E)
    assert out_lens.shape == (B,)
    print("KERNEL_OK")
</pallas_src>

<mosaic_0001>
module attributes {stable_mosaic.version = 11 : i64} {
  func.func @word_bilstm_kernel(%arg0: i32, %arg1: memref<2x1xi32, #tpu.memory_space<vmem>>, %arg2: memref<8x2x32xf32, #tpu.memory_space<vmem>>, %arg3: memref<32x256xf32, #tpu.memory_space<vmem>>, %arg4: memref<1x256xf32, #tpu.memory_space<vmem>>, %arg5: memref<32x128xf32, #tpu.memory_space<vmem>>, %arg6: memref<32x128xf32, #tpu.memory_space<vmem>>, %arg7: memref<32x32xf32, #tpu.memory_space<vmem>>, %arg8: memref<32x32xf32, #tpu.memory_space<vmem>>, %arg9: memref<1x32xf32, #tpu.memory_space<vmem>>, %arg10: memref<8x2x32xf32, #tpu.memory_space<vmem>>, %arg11: memref<8x2x128xf32, #tpu.memory_space<vmem>>, %arg12: memref<8x2x128xf32, #tpu.memory_space<vmem>>, %arg13: memref<8x2x32xf32, #tpu.memory_space<vmem>>, %arg14: memref<8x2x32xf32, #tpu.memory_space<vmem>>) attributes {dimension_semantics = [#tpu.dimension_semantics<parallel>], iteration_bounds = array<i64: 1>, scalar_prefetch = 0 : i64, scratch_operands = 4 : i64, tpu.core_type = #tpu.core_type<tc>, window_params = [{transform_indices = @transform_0, window_bounds = array<i64: 2, 1>}, {transform_indices = @transform_1, window_bounds = array<i64: 8, 2, 32>}, {pipeline_mode = #tpu.pipeline_mode<synchronous>, transform_indices = @transform_2, window_bounds = array<i64: 32, 256>}, {pipeline_mode = #tpu.pipeline_mode<synchronous>, transform_indices = @transform_3, window_bounds = array<i64: 1, 256>}, {pipeline_mode = #tpu.pipeline_mode<synchronous>, transform_indices = @transform_4, window_bounds = array<i64: 32, 128>}, {pipeline_mode = #tpu.pipeline_mode<synchronous>, transform_indices = @transform_5, window_bounds = array<i64: 32, 128>}, {pipeline_mode = #tpu.pipeline_mode<synchronous>, transform_indices = @transform_6, window_bounds = array<i64: 32, 32>}, {pipeline_mode = #tpu.pipeline_mode<synchronous>, transform_indices = @transform_7, window_bounds = array<i64: 32, 32>}, {pipeline_mode = #tpu.pipeline_mode<synchronous>, transform_indices = @transform_8, window_bounds = array<i64: 1, 32>}, {transform_indices = @transform_9, window_bounds = array<i64: 8, 2, 32>}]} {
    %c0 = arith.constant 0 : index
    %c0_0 = arith.constant 0 : index
    %c0_1 = arith.constant 0 : index
    %0 = vector.load %arg2[%c0, %c0_0, %c0_1] : memref<8x2x32xf32, #tpu.memory_space<vmem>>, vector<8x2x32xf32>
    %c0_2 = arith.constant 0 : index
    %c0_3 = arith.constant 0 : index
    %1 = vector.load %arg1[%c0_2, %c0_3] : memref<2x1xi32, #tpu.memory_space<vmem>>, vector<2x1xi32>
    %c0_4 = arith.constant 0 : index
    %c0_5 = arith.constant 0 : index
    %2 = vector.load %arg5[%c0_4, %c0_5] : memref<32x128xf32, #tpu.memory_space<vmem>>, vector<32x128xf32>
    %c0_6 = arith.constant 0 : index
    %c0_7 = arith.constant 0 : index
    %3 = vector.load %arg6[%c0_6, %c0_7] : memref<32x128xf32, #tpu.memory_space<vmem>>, vector<32x128xf32>
    %4 = vector.shape_cast %0 : vector<8x2x32xf32> to vector<16x32xf32>
    %c0_8 = arith.constant 0 : index
    %c0_9 = arith.constant 0 : index
    %5 = vector.load %arg3[%c0_8, %c0_9] : memref<32x256xf32, #tpu.memory_space<vmem>>, vector<32x256xf32>
    %cst = arith.constant dense<0.000000e+00> : vector<16x256xf32>
    %6 = tpu.matmul %4, %5, %cst {dimension_numbers = #tpu.dot_dimension_numbers<[1], [0], [0], [1], [0, 0, 1, 1], [], []>} : vector<16x32xf32>, vector<32x256xf32>, vector<16x256xf32> -> vector<16x256xf32>
    %c0_10 = arith.constant 0 : index
    %c0_11 = arith.constant 0 : index
    %7 = vector.load %arg4[%c0_10, %c0_11] : memref<1x256xf32, #tpu.memory_space<vmem>>, vector<1x256xf32>
    %8 = vector.broadcast %7 : vector<1x256xf32> to vector<16x256xf32>
    %9 = arith.addf %6, %8 : vector<16x256xf32>
    %10 = vector.shape_cast %9 : vector<16x256xf32> to vector<8x2x256xf32>
    %11 = vector.extract_strided_slice %10 {offsets = [0, 0, 0], sizes = [8, 2, 128], strides = [1, 1, 1]} : vector<8x2x256xf32> to vector<8x2x128xf32>
    %c0_12 = arith.constant 0 : index
    %c0_13 = arith.constant 0 : index
    %c0_14 = arith.constant 0 : index
    %12 = vector.load %arg11[%c0_12, %c0_13, %c0_14] : memref<8x2x128xf32, #tpu.memory_space<vmem>>, vector<8x2x128xf32>
    tpu.vector_store %arg11[%c0_12, %c0_13, %c0_14], %11 {strides = array<i32>} : memref<8x2x128xf32, #tpu.memory_space<vmem>>, vector<8x2x128xf32>,
    %13 = vector.extract_strided_slice %10 {offsets = [0, 0, 128], sizes = [8, 2, 128], strides = [1, 1, 1]} : vector<8x2x256xf32> to vector<8x2x128xf32>
    %c0_15 = arith.constant 0 : index
    %c0_16 = arith.constant 0 : index
    %c0_17 = arith.constant 0 : index
    %14 = vector.load %arg12[%c0_15, %c0_16, %c0_17] : memref<8x2x128xf32, #tpu.memory_space<vmem>>, vector<8x2x128xf32>
    tpu.vector_store %arg12[%c0_15, %c0_16, %c0_17], %13 {strides = array<i32>} : memref<8x2x128xf32, #tpu.memory_space<vmem>>, vector<8x2x128xf32>,
    %cst_18 = arith.constant 0.000000e+00 : f32
    %15 = vector.broadcast %cst_18 : f32 to vector<2x32xf32>
    %c0_i32 = arith.constant 0 : i32
    %16 = arith.index_cast %c0_i32 : i32 to index
    %c0_19 = arith.constant 0 : index
    %c0_20 = arith.constant 0 : index
    %17 = vector.load %arg11[%16, %c0_19, %c0_20] : memref<8x2x128xf32, #tpu.memory_space<vmem>>, vector<1x2x128xf32>
    %18 = vector.shape_cast %17 : vector<1x2x128xf32> to vector<2x128xf32>
    %cst_21 = arith.constant dense<0.000000e+00> : vector<2x128xf32>
    %19 = tpu.matmul %15, %2, %cst_21 {dimension_numbers = #tpu.dot_dimension_numbers<[1], [0], [0], [1], [0, 0, 1, 1], [], []>} : vector<2x32xf32>, vector<32x128xf32>, vector<2x128xf32> -> vector<2x128xf32>
    %20 = arith.addf %18, %19 : vector<2x128xf32>
    %21 = vector.extract_strided_slice %20 {offsets = [0, 0], sizes = [2, 32], strides = [1, 1]} : vector<2x128xf32> to vector<2x32xf32>
    %22 = arith.negf %21 : vector<2x32xf32>
    %23 = math.exp %22 : vector<2x32xf32>
    %cst_22 = arith.constant 1.000000e+00 : f32
    %24 = vector.broadcast %cst_22 : f32 to vector<2x32xf32>
    %25 = arith.addf %24, %23 : vector<2x32xf32>
    %26 = arith.divf %24, %25 : vector<2x32xf32>
    %27 = vector.extract_strided_slice %20 {offsets = [0, 32], sizes = [2, 32], strides = [1, 1]} : vector<2x128xf32> to vector<2x32xf32>
    %28 = arith.negf %27 : vector<2x32xf32>
    %29 = math.exp %28 : vector<2x32xf32>
    %cst_23 = arith.constant 1.000000e+00 : f32
    %30 = vector.broadcast %cst_23 : f32 to vector<2x32xf32>
    %31 = arith.addf %30, %29 : vector<2x32xf32>
    %32 = arith.divf %30, %31 : vector<2x32xf32>
    %33 = vector.extract_strided_slice %20 {offsets = [0, 64], sizes = [2, 32], strides = [1, 1]} : vector<2x128xf32> to vector<2x32xf32>
    %34 = math.tanh %33 : vector<2x32xf32>
    %35 = vector.extract_strided_slice %20 {offsets = [0, 96], sizes = [2, 32], strides = [1, 1]} : vector<2x128xf32> to vector<2x32xf32>
    %36 = arith.negf %35 : vector<2x32xf32>
    %37 = math.exp %36 : vector<2x32xf32>
    %cst_24 = arith.constant 1.000000e+00 : f32
    %38 = vector.broadcast %cst_24 : f32 to vector<2x32xf32>
    %39 = arith.addf %38, %37 : vector<2x32xf32>
    %40 = arith.divf %38, %39 : vector<2x32xf32>
    %41 = arith.mulf %32, %15 : vector<2x32xf32>
    %42 = arith.mulf %26, %34 : vector<2x32xf32>
    %43 = arith.addf %41, %42 : vector<2x32xf32>
    %44 = math.tanh %43 : vector<2x32xf32>
    %45 = arith.mulf %40, %44 : vector<2x32xf32>
    %46 = vector.broadcast %c0_i32 : i32 to vector<2x1xi32>
    %47 = arith.cmpi slt, %46, %1 : vector<2x1xi32>
    %cst_25 = arith.constant 0.000000e+00 : f32
    %48 = vector.shape_cast %47 : vector<2x1xi1> to vector<2x1xi1>
    %49 = vector.broadcast %48 : vector<2x1xi1> to vector<2x32xi1>
    %50 = vector.broadcast %cst_25 : f32 to vector<2x32xf32>
    %51 = arith.select %49, %45, %50 : vector<2x32xi1>, vector<2x32xf32>
    %52 = arith.index_cast %c0_i32 : i32 to index
    %c0_26 = arith.constant 0 : index
    %c0_27 = arith.constant 0 : index
    %53 = vector.load %arg13[%52, %c0_26, %c0_27] : memref<8x2x32xf32, #tpu.memory_space<vmem>>, vector<1x2x32xf32>
    %54 = vector.shape_cast %53 : vector<1x2x32xf32> to vector<2x32xf32>
    %55 = vector.shape_cast %51 : vector<2x32xf32> to vector<1x2x32xf32>
    tpu.vector_store %arg13[%52, %c0_26, %c0_27], %55 {strides = array<i32>} : memref<8x2x32xf32, #tpu.memory_space<vmem>>, vector<1x2x32xf32>,
    %56 = vector.shape_cast %47 : vector<2x1xi1> to vector<2x1xi1>
    %57 = vector.broadcast %56 : vector<2x1xi1> to vector<2x32xi1>
    %58 = arith.select %57, %45, %15 : vector<2x32xi1>, vector<2x32xf32>
    %59 = vector.shape_cast %47 : vector<2x1xi1> to vector<2x1xi1>
    %60 = vector.broadcast %59 : vector<2x1xi1> to vector<2x32xi1>
    %61 = arith.select %60, %43, %15 : vector<2x32xi1>, vector<2x32xf32>
    %c1_i32 = arith.constant 1 : i32
    %62 = arith.index_cast %c1_i32 : i32 to index
    %c0_28 = arith.constant 0 : index
    %c0_29 = arith.constant 0 : index
    %63 = vector.load %arg11[%62, %c0_28, %c0_29] : memref<8x2x128xf32, #tpu.memory_space<vmem>>, vector<1x2x128xf32>
    %64 = vector.shape_cast %63 : vector<1x2x128xf32> to vector<2x128xf32>
    %cst_30 = arith.constant dense<0.000000e+00> : vector<2x128xf32>
    %65 = tpu.matmul %58, %2, %cst_30 {dimension_numbers = #tpu.dot_dimension_numbers<[1], [0], [0], [1], [0, 0, 1, 1], [], []>} : vector<2x32xf32>, vector<32x128xf32>, vector<2x128xf32> -> vector<2x128xf32>
    %66 = arith.addf %64, %65 : vector<2x128xf32>
    %67 = vector.extract_strided_slice %66 {offsets = [0, 0], sizes = [2, 32], strides = [1, 1]} : vector<2x128xf32> to vector<2x32xf32>
    %68 = arith.negf %67 : vector<2x32xf32>
    %69 = math.exp %68 : vector<2x32xf32>
    %cst_31 = arith.constant 1.000000e+00 : f32
    %70 = vector.broadcast %cst_31 : f32 to vector<2x32xf32>
    %71 = arith.addf %70, %69 : vector<2x32xf32>
    %72 = arith.divf %70, %71 : vector<2x32xf32>
    %73 = vector.extract_strided_slice %66 {offsets = [0, 32], sizes = [2, 32], strides = [1, 1]} : vector<2x128xf32> to vector<2x32xf32>
    %74 = arith.negf %73 : vector<2x32xf32>
    %75 = math.exp %74 : vector<2x32xf32>
    %cst_32 = arith.constant 1.000000e+00 : f32
    %76 = vector.broadcast %cst_32 : f32 to vector<2x32xf32>
    %77 = arith.addf %76, %75 : vector<2x32xf32>
    %78 = arith.divf %76, %77 : vector<2x32xf32>
    %79 = vector.extract_strided_slice %66 {offsets = [0, 64], sizes = [2, 32], strides = [1, 1]} : vector<2x128xf32> to vector<2x32xf32>
    %80 = math.tanh %79 : vector<2x32xf32>
    %81 = vector.extract_strided_slice %66 {offsets = [0, 96], sizes = [2, 32], strides = [1, 1]} : vector<2x128xf32> to vector<2x32xf32>
    %82 = arith.negf %81 : vector<2x32xf32>
    %83 = math.exp %82 : vector<2x32xf32>
    %cst_33 = arith.constant 1.000000e+00 : f32
    %84 = vector.broadcast %cst_33 : f32 to vector<2x32xf32>
    %85 = arith.addf %84, %83 : vector<2x32xf32>
    %86 = arith.divf %84, %85 : vector<2x32xf32>
    %87 = arith.mulf %78, %61 : vector<2x32xf32>
    %88 = arith.mulf %72, %80 : vector<2x32xf32>
    %89 = arith.addf %87, %88 : vector<2x32xf32>
    %90 = math.tanh %89 : vector<2x32xf32>
    %91 = arith.mulf %86, %90 : vector<2x32xf32>
    %92 = vector.broadcast %c1_i32 : i32 to vector<2x1xi32>
    %93 = arith.cmpi slt, %92, %1 : vector<2x1xi32>
    %cst_34 = arith.constant 0.000000e+00 : f32
    %94 = vector.shape_cast %93 : vector<2x1xi1> to vector<2x1xi1>
    %95 = vector.broadcast %94 : vector<2x1xi1> to vector<2x32xi1>
    %96 = vector.broadcast %cst_34 : f32 to vector<2x32xf32>
    %97 = arith.select %95, %91, %96 : vector<2x32xi1>, vector<2x32xf32>
    %98 = arith.index_cast %c1_i32 : i32 to index
    %c0_35 = arith.constant 0 : index
    %c0_36 = arith.constant 0 : index
    %99 = vector.load %arg13[%98, %c0_35, %c0_36] : memref<8x2x32xf32, #tpu.memory_space<vmem>>, vector<1x2x32xf32>
    %100 = vector.shape_cast %99 : vector<1x2x32xf32> to vector<2x32xf32>
    %101 = vector.shape_cast %97 : vector<2x32xf32> to vector<1x2x32xf32>
    tpu.vector_store %arg13[%98, %c0_35, %c0_36], %101 {strides = array<i32>} : memref<8x2x32xf32, #tpu.memory_space<vmem>>, vector<1x2x32xf32>,
    %102 = vector.shape_cast %93 : vector<2x1xi1> to vector<2x1xi1>
    %103 = vector.broadcast %102 : vector<2x1xi1> to vector<2x32xi1>
    %104 = arith.select %103, %91, %58 : vector<2x32xi1>, vector<2x32xf32>
    %105 = vector.shape_cast %93 : vector<2x1xi1> to vector<2x1xi1>
    %106 = vector.broadcast %105 : vector<2x1xi1> to vector<2x32xi1>
    %107 = arith.select %106, %89, %61 : vector<2x32xi1>, vector<2x32xf32>
    %c2_i32 = arith.constant 2 : i32
    %108 = arith.index_cast %c2_i32 : i32 to index
    %c0_37 = arith.constant 0 : index
    %c0_38 = arith.constant 0 : index
    %109 = vector.load %arg11[%108, %c0_37, %c0_38] : memref<8x2x128xf32, #tpu.memory_space<vmem>>, vector<1x2x128xf32>
    %110 = vector.shape_cast %109 : vector<1x2x128xf32> to vector<2x128xf32>
    %cst_39 = arith.constant dense<0.000000e+00> : vector<2x128xf32>
    %111 = tpu.matmul %104, %2, %cst_39 {dimension_numbers = #tpu.dot_dimension_numbers<[1], [0], [0], [1], [0, 0, 1, 1], [], []>} : vector<2x32xf32>, vector<32x128xf32>, vector<2x128xf32> -> vector<2x128xf32>
    %112 = arith.addf %110, %111 : vector<2x128xf32>
    %113 = vector.extract_strided_slice %112 {offsets = [0, 0], sizes = [2, 32], strides = [1, 1]} : vector<2x128xf32> to vector<2x32xf32>
    %114 = arith.negf %113 : vector<2x32xf32>
    %115 = math.exp %114 : vector<2x32xf32>
    %cst_40 = arith.constant 1.000000e+00 : f32
    %116 = vector.broadcast %cst_40 : f32 to vector<2x32xf32>
    %117 = arith.addf %116, %115 : vector<2x32xf32>
    %118 = arith.divf %116, %117 : vector<2x32xf32>
    %119 = vector.extract_strided_slice %112 {offsets = [0, 32], sizes = [2, 32], strides = [1, 1]} : vector<2x128xf32> to vector<2x32xf32>
    %120 = arith.negf %119 : vector<2x32xf32>
    %121 = math.exp %120 : vector<2x32xf32>
    %cst_41 = arith.constant 1.000000e+00 : f32
    %122 = vector.broadcast %cst_41 : f32 to vector<2x32xf32>
    %123 = arith.addf %122, %121 : vector<2x32xf32>
    %124 = arith.divf %122, %123 : vector<2x32xf32>
    %125 = vector.extract_strided_slice %112 {offsets = [0, 64], sizes = [2, 32], strides = [1, 1]} : vector<2x128xf32> to vector<2x32xf32>
    %126 = math.tanh %125 : vector<2x32xf32>
    %127 = vector.extract_strided_slice %112 {offsets = [0, 96], sizes = [2, 32], strides = [1, 1]} : vector<2x128xf32> to vector<2x32xf32>
    %128 = arith.negf %127 : vector<2x32xf32>
    %129 = math.exp %128 : vector<2x32xf32>
    %cst_42 = arith.constant 1.000000e+00 : f32
    %130 = vector.broadcast %cst_42 : f32 to vector<2x32xf32>
    %131 = arith.addf %130, %129 : vector<2x32xf32>
    %132 = arith.divf %130, %131 : vector<2x32xf32>
    %133 = arith.mulf %124, %107 : vector<2x32xf32>
    %134 = arith.mulf %118, %126 : vector<2x32xf32>
    %135 = arith.addf %133, %134 : vector<2x32xf32>
    %136 = math.tanh %135 : vector<2x32xf32>
    %137 = arith.mulf %132, %136 : vector<2x32xf32>
    %138 = vector.broadcast %c2_i32 : i32 to vector<2x1xi32>
    %139 = arith.cmpi slt, %138, %1 : vector<2x1xi32>
    %cst_43 = arith.constant 0.000000e+00 : f32
    %140 = vector.shape_cast %139 : vector<2x1xi1> to vector<2x1xi1>
    %141 = vector.broadcast %140 : vector<2x1xi1> to vector<2x32xi1>
    %142 = vector.broadcast %cst_43 : f32 to vector<2x32xf32>
    %143 = arith.select %141, %137, %142 : vector<2x32xi1>, vector<2x32xf32>
    %144 = arith.index_cast %c2_i32 : i32 to index
    %c0_44 = arith.constant 0 : index
    %c0_45 = arith.constant 0 : index
    %145 = vector.load %arg13[%144, %c0_44, %c0_45] : memref<8x2x32xf32, #tpu.memory_space<vmem>>, vector<1x2x32xf32>
    %146 = vector.shape_cast %145 : vector<1x2x32xf32> to vector<2x32xf32>
    %147 = vector.shape_cast %143 : vector<2x32xf32> to vector<1x2x32xf32>
    tpu.vector_store %arg13[%144, %c0_44, %c0_45], %147 {strides = array<i32>} : memref<8x2x32xf32, #tpu.memory_space<vmem>>, vector<1x2x32xf32>,
    %148 = vector.shape_cast %139 : vector<2x1xi1> to vector<2x1xi1>
    %149 = vector.broadcast %148 : vector<2x1xi1> to vector<2x32xi1>
    %150 = arith.select %149, %137, %104 : vector<2x32xi1>, vector<2x32xf32>
    %151 = vector.shape_cast %139 : vector<2x1xi1> to vector<2x1xi1>
    %152 = vector.broadcast %151 : vector<2x1xi1> to vector<2x32xi1>
    %153 = arith.select %152, %135, %107 : vector<2x32xi1>, vector<2x32xf32>
    %c3_i32 = arith.constant 3 : i32
    %154 = arith.index_cast %c3_i32 : i32 to index
    %c0_46 = arith.constant 0 : index
    %c0_47 = arith.constant 0 : index
    %155 = vector.load %arg11[%154, %c0_46, %c0_47] : memref<8x2x128xf32, #tpu.memory_space<vmem>>, vector<1x2x128xf32>
    %156 = vector.shape_cast %155 : vector<1x2x128xf32> to vector<2x128xf32>
    %cst_48 = arith.constant dense<0.000000e+00> : vector<2x128xf32>
    %157 = tpu.matmul %150, %2, %cst_48 {dimension_numbers = #tpu.dot_dimension_numbers<[1], [0], [0], [1], [0, 0, 1, 1], [], []>} : vector<2x32xf32>, vector<32x128xf32>, vector<2x128xf32> -> vector<2x128xf32>
    %158 = arith.addf %156, %157 : vector<2x128xf32>
    %159 = vector.extract_strided_slice %158 {offsets = [0, 0], sizes = [2, 32], strides = [1, 1]} : vector<2x128xf32> to vector<2x32xf32>
    %160 = arith.negf %159 : vector<2x32xf32>
    %161 = math.exp %160 : vector<2x32xf32>
    %cst_49 = arith.constant 1.000000e+00 : f32
    %162 = vector.broadcast %cst_49 : f32 to vector<2x32xf32>
    %163 = arith.addf %162, %161 : vector<2x32xf32>
    %164 = arith.divf %162, %163 : vector<2x32xf32>
    %165 = vector.extract_strided_slice %158 {offsets = [0, 32], sizes = [2, 32], strides = [1, 1]} : vector<2x128xf32> to vector<2x32xf32>
    %166 = arith.negf %165 : vector<2x32xf32>
    %167 = math.exp %166 : vector<2x32xf32>
    %cst_50 = arith.constant 1.000000e+00 : f32
    %168 = vector.broadcast %cst_50 : f32 to vector<2x32xf32>
    %169 = arith.addf %168, %167 : vector<2x32xf32>
    %170 = arith.divf %168, %169 : vector<2x32xf32>
    %171 = vector.extract_strided_slice %158 {offsets = [0, 64], sizes = [2, 32], strides = [1, 1]} : vector<2x128xf32> to vector<2x32xf32>
    %172 = math.tanh %171 : vector<2x32xf32>
    %173 = vector.extract_strided_slice %158 {offsets = [0, 96], sizes = [2, 32], strides = [1, 1]} : vector<2x128xf32> to vector<2x32xf32>
    %174 = arith.negf %173 : vector<2x32xf32>
    %175 = math.exp %174 : vector<2x32xf32>
    %cst_51 = arith.constant 1.000000e+00 : f32
    %176 = vector.broadcast %cst_51 : f32 to vector<2x32xf32>
    %177 = arith.addf %176, %175 : vector<2x32xf32>
    %178 = arith.divf %176, %177 : vector<2x32xf32>
    %179 = arith.mulf %170, %153 : vector<2x32xf32>
    %180 = arith.mulf %164, %172 : vector<2x32xf32>
    %181 = arith.addf %179, %180 : vector<2x32xf32>
    %182 = math.tanh %181 : vector<2x32xf32>
    %183 = arith.mulf %178, %182 : vector<2x32xf32>
    %184 = vector.broadcast %c3_i32 : i32 to vector<2x1xi32>
    %185 = arith.cmpi slt, %184, %1 : vector<2x1xi32>
    %cst_52 = arith.constant 0.000000e+00 : f32
    %186 = vector.shape_cast %185 : vector<2x1xi1> to vector<2x1xi1>
    %187 = vector.broadcast %186 : vector<2x1xi1> to vector<2x32xi1>
    %188 = vector.broadcast %cst_52 : f32 to vector<2x32xf32>
    %189 = arith.select %187, %183, %188 : vector<2x32xi1>, vector<2x32xf32>
    %190 = arith.index_cast %c3_i32 : i32 to index
    %c0_53 = arith.constant 0 : index
    %c0_54 = arith.constant 0 : index
    %191 = vector.load %arg13[%190, %c0_53, %c0_54] : memref<8x2x32xf32, #tpu.memory_space<vmem>>, vector<1x2x32xf32>
    %192 = vector.shape_cast %191 : vector<1x2x32xf32> to vector<2x32xf32>
    %193 = vector.shape_cast %189 : vector<2x32xf32> to vector<1x2x32xf32>
    tpu.vector_store %arg13[%190, %c0_53, %c0_54], %193 {strides = array<i32>} : memref<8x2x32xf32, #tpu.memory_space<vmem>>, vector<1x2x32xf32>,
    %194 = vector.shape_cast %185 : vector<2x1xi1> to vector<2x1xi1>
    %195 = vector.broadcast %194 : vector<2x1xi1> to vector<2x32xi1>
    %196 = arith.select %195, %183, %150 : vector<2x32xi1>, vector<2x32xf32>
    %197 = vector.shape_cast %185 : vector<2x1xi1> to vector<2x1xi1>
    %198 = vector.broadcast %197 : vector<2x1xi1> to vector<2x32xi1>
    %199 = arith.select %198, %181, %153 : vector<2x32xi1>, vector<2x32xf32>
    %c4_i32 = arith.constant 4 : i32
    %200 = arith.index_cast %c4_i32 : i32 to index
    %c0_55 = arith.constant 0 : index
    %c0_56 = arith.constant 0 : index
    %201 = vector.load %arg11[%200, %c0_55, %c0_56] : memref<8x2x128xf32, #tpu.memory_space<vmem>>, vector<1x2x128xf32>
    %202 = vector.shape_cast %201 : vector<1x2x128xf32> to vector<2x128xf32>
    %cst_57 = arith.constant dense<0.000000e+00> : vector<2x128xf32>
    %203 = tpu.matmul %196, %2, %cst_57 {dimension_numbers = #tpu.dot_dimension_numbers<[1], [0], [0], [1], [0, 0, 1, 1], [], []>} : vector<2x32xf32>, vector<32x128xf32>, vector<2x128xf32> -> vector<2x128xf32>
    %204 = arith.addf %202, %203 : vector<2x128xf32>
    %205 = vector.extract_strided_slice %204 {offsets = [0, 0], sizes = [2, 32], strides = [1, 1]} : vector<2x128xf32> to vector<2x32xf32>
    %206 = arith.negf %205 : vector<2x32xf32>
    %207 = math.exp %206 : vector<2x32xf32>
    %cst_58 = arith.constant 1.000000e+00 : f32
    %208 = vector.broadcast %cst_58 : f32 to vector<2x32xf32>
    %209 = arith.addf %208, %207 : vector<2x32xf32>
    %210 = arith.divf %208, %209 : vector<2x32xf32>
    %211 = vector.extract_strided_slice %204 {offsets = [0, 32], sizes = [2, 32], strides = [1, 1]} : vector<2x128xf32> to vector<2x32xf32>
    %212 = arith.negf %211 : vector<2x32xf32>
    %213 = math.exp %212 : vector<2x32xf32>
    %cst_59 = arith.constant 1.000000e+00 : f32
    %214 = vector.broadcast %cst_59 : f32 to vector<2x32xf32>
    %215 = arith.addf %214, %213 : vector<2x32xf32>
    %216 = arith.divf %214, %215 : vector<2x32xf32>
    %217 = vector.extract_strided_slice %204 {offsets = [0, 64], sizes = [2, 32], strides = [1, 1]} : vector<2x128xf32> to vector<2x32xf32>
    %218 = math.tanh %217 : vector<2x32xf32>
    %219 = vector.extract_strided_slice %204 {offsets = [0, 96], sizes = [2, 32], strides = [1, 1]} : vector<2x128xf32> to vector<2x32xf32>
    %220 = arith.negf %219 : vector<2x32xf32>
    %221 = math.exp %220 : vector<2x32xf32>
    %cst_60 = arith.constant 1.000000e+00 : f32
    %222 = vector.broadcast %cst_60 : f32 to vector<2x32xf32>
    %223 = arith.addf %222, %221 : vector<2x32xf32>
    %224 = arith.divf %222, %223 : vector<2x32xf32>
    %225 = arith.mulf %216, %199 : vector<2x32xf32>
    %226 = arith.mulf %210, %218 : vector<2x32xf32>
    %227 = arith.addf %225, %226 : vector<2x32xf32>
    %228 = math.tanh %227 : vector<2x32xf32>
    %229 = arith.mulf %224, %228 : vector<2x32xf32>
    %230 = vector.broadcast %c4_i32 : i32 to vector<2x1xi32>
    %231 = arith.cmpi slt, %230, %1 : vector<2x1xi32>
    %cst_61 = arith.constant 0.000000e+00 : f32
    %232 = vector.shape_cast %231 : vector<2x1xi1> to vector<2x1xi1>
    %233 = vector.broadcast %232 : vector<2x1xi1> to vector<2x32xi1>
    %234 = vector.broadcast %cst_61 : f32 to vector<2x32xf32>
    %235 = arith.select %233, %229, %234 : vector<2x32xi1>, vector<2x32xf32>
    %236 = arith.index_cast %c4_i32 : i32 to index
    %c0_62 = arith.constant 0 : index
    %c0_63 = arith.constant 0 : index
    %237 = vector.load %arg13[%236, %c0_62, %c0_63] : memref<8x2x32xf32, #tpu.memory_space<vmem>>, vector<1x2x32xf32>
    %238 = vector.shape_cast %237 : vector<1x2x32xf32> to vector<2x32xf32>
    %239 = vector.shape_cast %235 : vector<2x32xf32> to vector<1x2x32xf32>
    tpu.vector_store %arg13[%236, %c0_62, %c0_63], %239 {strides = array<i32>} : memref<8x2x32xf32, #tpu.memory_space<vmem>>, vector<1x2x32xf32>,
    %240 = vector.shape_cast %231 : vector<2x1xi1> to vector<2x1xi1>
    %241 = vector.broadcast %240 : vector<2x1xi1> to vector<2x32xi1>
    %242 = arith.select %241, %229, %196 : vector<2x32xi1>, vector<2x32xf32>
    %243 = vector.shape_cast %231 : vector<2x1xi1> to vector<2x1xi1>
    %244 = vector.broadcast %243 : vector<2x1xi1> to vector<2x32xi1>
    %245 = arith.select %244, %227, %199 : vector<2x32xi1>, vector<2x32xf32>
    %c5_i32 = arith.constant 5 : i32
    %246 = arith.index_cast %c5_i32 : i32 to index
    %c0_64 = arith.constant 0 : index
    %c0_65 = arith.constant 0 : index
    %247 = vector.load %arg11[%246, %c0_64, %c0_65] : memref<8x2x128xf32, #tpu.memory_space<vmem>>, vector<1x2x128xf32>
    %248 = vector.shape_cast %247 : vector<1x2x128xf32> to vector<2x128xf32>
    %cst_66 = arith.constant dense<0.000000e+00> : vector<2x128xf32>
    %249 = tpu.matmul %242, %2, %cst_66 {dimension_numbers = #tpu.dot_dimension_numbers<[1], [0], [0], [1], [0, 0, 1, 1], [], []>} : vector<2x32xf32>, vector<32x128xf32>, vector<2x128xf32> -> vector<2x128xf32>
    %250 = arith.addf %248, %249 : vector<2x128xf32>
    %251 = vector.extract_strided_slice %250 {offsets = [0, 0], sizes = [2, 32], strides = [1, 1]} : vector<2x128xf32> to vector<2x32xf32>
    %252 = arith.negf %251 : vector<2x32xf32>
    %253 = math.exp %252 : vector<2x32xf32>
    %cst_67 = arith.constant 1.000000e+00 : f32
    %254 = vector.broadcast %cst_67 : f32 to vector<2x32xf32>
    %255 = arith.addf %254, %253 : vector<2x32xf32>
    %256 = arith.divf %254, %255 : vector<2x32xf32>
    %257 = vector.extract_strided_slice %250 {offsets = [0, 32], sizes = [2, 32], strides = [1, 1]} : vector<2x128xf32> to vector<2x32xf32>
    %258 = arith.negf %257 : vector<2x32xf32>
    %259 = math.exp %258 : vector<2x32xf32>
    %cst_68 = arith.constant 1.000000e+00 : f32
    %260 = vector.broadcast %cst_68 : f32 to vector<2x32xf32>
    %261 = arith.addf %260, %259 : vector<2x32xf32>
    %262 = arith.divf %260, %261 : vector<2x32xf32>
    %263 = vector.extract_strided_slice %250 {offsets = [0, 64], sizes = [2, 32], strides = [1, 1]} : vector<2x128xf32> to vector<2x32xf32>
    %264 = math.tanh %263 : vector<2x32xf32>
    %265 = vector.extract_strided_slice %250 {offsets = [0, 96], sizes = [2, 32], strides = [1, 1]} : vector<2x128xf32> to vector<2x32xf32>
    %266 = arith.negf %265 : vector<2x32xf32>
    %267 = math.exp %266 : vector<2x32xf32>
    %cst_69 = arith.constant 1.000000e+00 : f32
    %268 = vector.broadcast %cst_69 : f32 to vector<2x32xf32>
    %269 = arith.addf %268, %267 : vector<2x32xf32>
    %270 = arith.divf %268, %269 : vector<2x32xf32>
    %271 = arith.mulf %262, %245 : vector<2x32xf32>
    %272 = arith.mulf %256, %264 : vector<2x32xf32>
    %273 = arith.addf %271, %272 : vector<2x32xf32>
    %274 = math.tanh %273 : vector<2x32xf32>
    %275 = arith.mulf %270, %274 : vector<2x32xf32>
    %276 = vector.broadcast %c5_i32 : i32 to vector<2x1xi32>
    %277 = arith.cmpi slt, %276, %1 : vector<2x1xi32>
    %cst_70 = arith.constant 0.000000e+00 : f32
    %278 = vector.shape_cast %277 : vector<2x1xi1> to vector<2x1xi1>
    %279 = vector.broadcast %278 : vector<2x1xi1> to vector<2x32xi1>
    %280 = vector.broadcast %cst_70 : f32 to vector<2x32xf32>
    %281 = arith.select %279, %275, %280 : vector<2x32xi1>, vector<2x32xf32>
    %282 = arith.index_cast %c5_i32 : i32 to index
    %c0_71 = arith.constant 0 : index
    %c0_72 = arith.constant 0 : index
    %283 = vector.load %arg13[%282, %c0_71, %c0_72] : memref<8x2x32xf32, #tpu.memory_space<vmem>>, vector<1x2x32xf32>
    %284 = vector.shape_cast %283 : vector<1x2x32xf32> to vector<2x32xf32>
    %285 = vector.shape_cast %281 : vector<2x32xf32> to vector<1x2x32xf32>
    tpu.vector_store %arg13[%282, %c0_71, %c0_72], %285 {strides = array<i32>} : memref<8x2x32xf32, #tpu.memory_space<vmem>>, vector<1x2x32xf32>,
    %286 = vector.shape_cast %277 : vector<2x1xi1> to vector<2x1xi1>
    %287 = vector.broadcast %286 : vector<2x1xi1> to vector<2x32xi1>
    %288 = arith.select %287, %275, %242 : vector<2x32xi1>, vector<2x32xf32>
    %289 = vector.shape_cast %277 : vector<2x1xi1> to vector<2x1xi1>
    %290 = vector.broadcast %289 : vector<2x1xi1> to vector<2x32xi1>
    %291 = arith.select %290, %273, %245 : vector<2x32xi1>, vector<2x32xf32>
    %c6_i32 = arith.constant 6 : i32
    %292 = arith.index_cast %c6_i32 : i32 to index
    %c0_73 = arith.constant 0 : index
    %c0_74 = arith.constant 0 : index
    %293 = vector.load %arg11[%292, %c0_73, %c0_74] : memref<8x2x128xf32, #tpu.memory_space<vmem>>, vector<1x2x128xf32>
    %294 = vector.shape_cast %293 : vector<1x2x128xf32> to vector<2x128xf32>
    %cst_75 = arith.constant dense<0.000000e+00> : vector<2x128xf32>
    %295 = tpu.matmul %288, %2, %cst_75 {dimension_numbers = #tpu.dot_dimension_numbers<[1], [0], [0], [1], [0, 0, 1, 1], [], []>} : vector<2x32xf32>, vector<32x128xf32>, vector<2x128xf32> -> vector<2x128xf32>
    %296 = arith.addf %294, %295 : vector<2x128xf32>
    %297 = vector.extract_strided_slice %296 {offsets = [0, 0], sizes = [2, 32], strides = [1, 1]} : vector<2x128xf32> to vector<2x32xf32>
    %298 = arith.negf %297 : vector<2x32xf32>
    %299 = math.exp %298 : vector<2x32xf32>
    %cst_76 = arith.constant 1.000000e+00 : f32
    %300 = vector.broadcast %cst_76 : f32 to vector<2x32xf32>
    %301 = arith.addf %300, %299 : vector<2x32xf32>
    %302 = arith.divf %300, %301 : vector<2x32xf32>
    %303 = vector.extract_strided_slice %296 {offsets = [0, 32], sizes = [2, 32], strides = [1, 1]} : vector<2x128xf32> to vector<2x32xf32>
    %304 = arith.negf %303 : vector<2x32xf32>
    %305 = math.exp %304 : vector<2x32xf32>
    %cst_77 = arith.constant 1.000000e+00 : f32
    %306 = vector.broadcast %cst_77 : f32 to vector<2x32xf32>
    %307 = arith.addf %306, %305 : vector<2x32xf32>
    %308 = arith.divf %306, %307 : vector<2x32xf32>
    %309 = vector.extract_strided_slice %296 {offsets = [0, 64], sizes = [2, 32], strides = [1, 1]} : vector<2x128xf32> to vector<2x32xf32>
    %310 = math.tanh %309 : vector<2x32xf32>
    %311 = vector.extract_strided_slice %296 {offsets = [0, 96], sizes = [2, 32], strides = [1, 1]} : vector<2x128xf32> to vector<2x32xf32>
    %312 = arith.negf %311 : vector<2x32xf32>
    %313 = math.exp %312 : vector<2x32xf32>
    %cst_78 = arith.constant 1.000000e+00 : f32
    %314 = vector.broadcast %cst_78 : f32 to vector<2x32xf32>
    %315 = arith.addf %314, %313 : vector<2x32xf32>
    %316 = arith.divf %314, %315 : vector<2x32xf32>
    %317 = arith.mulf %308, %291 : vector<2x32xf32>
    %318 = arith.mulf %302, %310 : vector<2x32xf32>
    %319 = arith.addf %317, %318 : vector<2x32xf32>
    %320 = math.tanh %319 : vector<2x32xf32>
    %321 = arith.mulf %316, %320 : vector<2x32xf32>
    %322 = vector.broadcast %c6_i32 : i32 to vector<2x1xi32>
    %323 = arith.cmpi slt, %322, %1 : vector<2x1xi32>
    %cst_79 = arith.constant 0.000000e+00 : f32
    %324 = vector.shape_cast %323 : vector<2x1xi1> to vector<2x1xi1>
    %325 = vector.broadcast %324 : vector<2x1xi1> to vector<2x32xi1>
    %326 = vector.broadcast %cst_79 : f32 to vector<2x32xf32>
    %327 = arith.select %325, %321, %326 : vector<2x32xi1>, vector<2x32xf32>
    %328 = arith.index_cast %c6_i32 : i32 to index
    %c0_80 = arith.constant 0 : index
    %c0_81 = arith.constant 0 : index
    %329 = vector.load %arg13[%328, %c0_80, %c0_81] : memref<8x2x32xf32, #tpu.memory_space<vmem>>, vector<1x2x32xf32>
    %330 = vector.shape_cast %329 : vector<1x2x32xf32> to vector<2x32xf32>
    %331 = vector.shape_cast %327 : vector<2x32xf32> to vector<1x2x32xf32>
    tpu.vector_store %arg13[%328, %c0_80, %c0_81], %331 {strides = array<i32>} : memref<8x2x32xf32, #tpu.memory_space<vmem>>, vector<1x2x32xf32>,
    %332 = vector.shape_cast %323 : vector<2x1xi1> to vector<2x1xi1>
    %333 = vector.broadcast %332 : vector<2x1xi1> to vector<2x32xi1>
    %334 = arith.select %333, %321, %288 : vector<2x32xi1>, vector<2x32xf32>
    %335 = vector.shape_cast %323 : vector<2x1xi1> to vector<2x1xi1>
    %336 = vector.broadcast %335 : vector<2x1xi1> to vector<2x32xi1>
    %337 = arith.select %336, %319, %291 : vector<2x32xi1>, vector<2x32xf32>
    %c7_i32 = arith.constant 7 : i32
    %338 = arith.index_cast %c7_i32 : i32 to index
    %c0_82 = arith.constant 0 : index
    %c0_83 = arith.constant 0 : index
    %339 = vector.load %arg11[%338, %c0_82, %c0_83] : memref<8x2x128xf32, #tpu.memory_space<vmem>>, vector<1x2x128xf32>
    %340 = vector.shape_cast %339 : vector<1x2x128xf32> to vector<2x128xf32>
    %cst_84 = arith.constant dense<0.000000e+00> : vector<2x128xf32>
    %341 = tpu.matmul %334, %2, %cst_84 {dimension_numbers = #tpu.dot_dimension_numbers<[1], [0], [0], [1], [0, 0, 1, 1], [], []>} : vector<2x32xf32>, vector<32x128xf32>, vector<2x128xf32> -> vector<2x128xf32>
    %342 = arith.addf %340, %341 : vector<2x128xf32>
    %343 = vector.extract_strided_slice %342 {offsets = [0, 0], sizes = [2, 32], strides = [1, 1]} : vector<2x128xf32> to vector<2x32xf32>
    %344 = arith.negf %343 : vector<2x32xf32>
    %345 = math.exp %344 : vector<2x32xf32>
    %cst_85 = arith.constant 1.000000e+00 : f32
    %346 = vector.broadcast %cst_85 : f32 to vector<2x32xf32>
    %347 = arith.addf %346, %345 : vector<2x32xf32>
    %348 = arith.divf %346, %347 : vector<2x32xf32>
    %349 = vector.extract_strided_slice %342 {offsets = [0, 32], sizes = [2, 32], strides = [1, 1]} : vector<2x128xf32> to vector<2x32xf32>
    %350 = arith.negf %349 : vector<2x32xf32>
    %351 = math.exp %350 : vector<2x32xf32>
    %cst_86 = arith.constant 1.000000e+00 : f32
    %352 = vector.broadcast %cst_86 : f32 to vector<2x32xf32>
    %353 = arith.addf %352, %351 : vector<2x32xf32>
    %354 = arith.divf %352, %353 : vector<2x32xf32>
    %355 = vector.extract_strided_slice %342 {offsets = [0, 64], sizes = [2, 32], strides = [1, 1]} : vector<2x128xf32> to vector<2x32xf32>
    %356 = math.tanh %355 : vector<2x32xf32>
    %357 = vector.extract_strided_slice %342 {offsets = [0, 96], sizes = [2, 32], strides = [1, 1]} : vector<2x128xf32> to vector<2x32xf32>
    %358 = arith.negf %357 : vector<2x32xf32>
    %359 = math.exp %358 : vector<2x32xf32>
    %cst_87 = arith.constant 1.000000e+00 : f32
    %360 = vector.broadcast %cst_87 : f32 to vector<2x32xf32>
    %361 = arith.addf %360, %359 : vector<2x32xf32>
    %362 = arith.divf %360, %361 : vector<2x32xf32>
    %363 = arith.mulf %354, %337 : vector<2x32xf32>
    %364 = arith.mulf %348, %356 : vector<2x32xf32>
    %365 = arith.addf %363, %364 : vector<2x32xf32>
    %366 = math.tanh %365 : vector<2x32xf32>
    %367 = arith.mulf %362, %366 : vector<2x32xf32>
    %368 = vector.broadcast %c7_i32 : i32 to vector<2x1xi32>
    %369 = arith.cmpi slt, %368, %1 : vector<2x1xi32>
    %cst_88 = arith.constant 0.000000e+00 : f32
    %370 = vector.shape_cast %369 : vector<2x1xi1> to vector<2x1xi1>
    %371 = vector.broadcast %370 : vector<2x1xi1> to vector<2x32xi1>
    %372 = vector.broadcast %cst_88 : f32 to vector<2x32xf32>
    %373 = arith.select %371, %367, %372 : vector<2x32xi1>, vector<2x32xf32>
    %374 = arith.index_cast %c7_i32 : i32 to index
    %c0_89 = arith.constant 0 : index
    %c0_90 = arith.constant 0 : index
    %375 = vector.load %arg13[%374, %c0_89, %c0_90] : memref<8x2x32xf32, #tpu.memory_space<vmem>>, vector<1x2x32xf32>
    %376 = vector.shape_cast %375 : vector<1x2x32xf32> to vector<2x32xf32>
    %377 = vector.shape_cast %373 : vector<2x32xf32> to vector<1x2x32xf32>
    tpu.vector_store %arg13[%374, %c0_89, %c0_90], %377 {strides = array<i32>} : memref<8x2x32xf32, #tpu.memory_space<vmem>>, vector<1x2x32xf32>,
    %378 = vector.shape_cast %369 : vector<2x1xi1> to vector<2x1xi1>
    %379 = vector.broadcast %378 : vector<2x1xi1> to vector<2x32xi1>
    %380 = arith.select %379, %367, %334 : vector<2x32xi1>, vector<2x32xf32>
    %381 = vector.shape_cast %369 : vector<2x1xi1> to vector<2x1xi1>
    %382 = vector.broadcast %381 : vector<2x1xi1> to vector<2x32xi1>
    %383 = arith.select %382, %365, %337 : vector<2x32xi1>, vector<2x32xf32>
    %c8_i32 = arith.constant 8 : i32
    %c0_i32_91 = arith.constant 0 : i32
    %c7_i32_92 = arith.constant 7 : i32
    %384 = arith.subi %c7_i32_92, %c0_i32_91 : i32
    %385 = arith.index_cast %384 : i32 to index
    %c0_93 = arith.constant 0 : index
    %c0_94 = arith.constant 0 : index
    %386 = vector.load %arg12[%385, %c0_93, %c0_94] : memref<8x2x128xf32, #tpu.memory_space<vmem>>, vector<1x2x128xf32>
    %387 = vector.shape_cast %386 : vector<1x2x128xf32> to vector<2x128xf32>
    %cst_95 = arith.constant dense<0.000000e+00> : vector<2x128xf32>
    %388 = tpu.matmul %15, %3, %cst_95 {dimension_numbers = #tpu.dot_dimension_numbers<[1], [0], [0], [1], [0, 0, 1, 1], [], []>} : vector<2x32xf32>, vector<32x128xf32>, vector<2x128xf32> -> vector<2x128xf32>
    %389 = arith.addf %387, %388 : vector<2x128xf32>
    %390 = vector.extract_strided_slice %389 {offsets = [0, 0], sizes = [2, 32], strides = [1, 1]} : vector<2x128xf32> to vector<2x32xf32>
    %391 = arith.negf %390 : vector<2x32xf32>
    %392 = math.exp %391 : vector<2x32xf32>
    %cst_96 = arith.constant 1.000000e+00 : f32
    %393 = vector.broadcast %cst_96 : f32 to vector<2x32xf32>
    %394 = arith.addf %393, %392 : vector<2x32xf32>
    %395 = arith.divf %393, %394 : vector<2x32xf32>
    %396 = vector.extract_strided_slice %389 {offsets = [0, 32], sizes = [2, 32], strides = [1, 1]} : vector<2x128xf32> to vector<2x32xf32>
    %397 = arith.negf %396 : vector<2x32xf32>
    %398 = math.exp %397 : vector<2x32xf32>
    %cst_97 = arith.constant 1.000000e+00 : f32
    %399 = vector.broadcast %cst_97 : f32 to vector<2x32xf32>
    %400 = arith.addf %399, %398 : vector<2x32xf32>
    %401 = arith.divf %399, %400 : vector<2x32xf32>
    %402 = vector.extract_strided_slice %389 {offsets = [0, 64], sizes = [2, 32], strides = [1, 1]} : vector<2x128xf32> to vector<2x32xf32>
    %403 = math.tanh %402 : vector<2x32xf32>
    %404 = vector.extract_strided_slice %389 {offsets = [0, 96], sizes = [2, 32], strides = [1, 1]} : vector<2x128xf32> to vector<2x32xf32>
    %405 = arith.negf %404 : vector<2x32xf32>
    %406 = math.exp %405 : vector<2x32xf32>
    %cst_98 = arith.constant 1.000000e+00 : f32
    %407 = vector.broadcast %cst_98 : f32 to vector<2x32xf32>
    %408 = arith.addf %407, %406 : vector<2x32xf32>
    %409 = arith.divf %407, %408 : vector<2x32xf32>
    %410 = arith.mulf %401, %15 : vector<2x32xf32>
    %411 = arith.mulf %395, %403 : vector<2x32xf32>
    %412 = arith.addf %410, %411 : vector<2x32xf32>
    %413 = math.tanh %412 : vector<2x32xf32>
    %414 = arith.mulf %409, %413 : vector<2x32xf32>
    %415 = vector.broadcast %384 : i32 to vector<2x1xi32>
    %416 = arith.cmpi slt, %415, %1 : vector<2x1xi32>
    %cst_99 = arith.constant 0.000000e+00 : f32
    %417 = vector.shape_cast %416 : vector<2x1xi1> to vector<2x1xi1>
    %418 = vector.broadcast %417 : vector<2x1xi1> to vector<2x32xi1>
    %419 = vector.broadcast %cst_99 : f32 to vector<2x32xf32>
    %420 = arith.select %418, %414, %419 : vector<2x32xi1>, vector<2x32xf32>
    %421 = arith.index_cast %384 : i32 to index
    %c0_100 = arith.constant 0 : index
    %c0_101 = arith.constant 0 : index
    %422 = vector.load %arg14[%421, %c0_100, %c0_101] : memref<8x2x32xf32, #tpu.memory_space<vmem>>, vector<1x2x32xf32>
    %423 = vector.shape_cast %422 : vector<1x2x32xf32> to vector<2x32xf32>
    %424 = vector.shape_cast %420 : vector<2x32xf32> to vector<1x2x32xf32>
    tpu.vector_store %arg14[%421, %c0_100, %c0_101], %424 {strides = array<i32>} : memref<8x2x32xf32, #tpu.memory_space<vmem>>, vector<1x2x32xf32>,
    %425 = vector.shape_cast %416 : vector<2x1xi1> to vector<2x1xi1>
    %426 = vector.broadcast %425 : vector<2x1xi1> to vector<2x32xi1>
    %427 = arith.select %426, %414, %15 : vector<2x32xi1>, vector<2x32xf32>
    %428 = vector.shape_cast %416 : vector<2x1xi1> to vector<2x1xi1>
    %429 = vector.broadcast %428 : vector<2x1xi1> to vector<2x32xi1>
    %430 = arith.select %429, %412, %15 : vector<2x32xi1>, vector<2x32xf32>
    %c1_i32_102 = arith.constant 1 : i32
    %c7_i32_103 = arith.constant 7 : i32
    %431 = arith.subi %c7_i32_103, %c1_i32_102 : i32
    %432 = arith.index_cast %431 : i32 to index
    %c0_104 = arith.constant 0 : index
    %c0_105 = arith.constant 0 : index
    %433 = vector.load %arg12[%432, %c0_104, %c0_105] : memref<8x2x128xf32, #tpu.memory_space<vmem>>, vector<1x2x128xf32>
    %434 = vector.shape_cast %433 : vector<1x2x128xf32> to vector<2x128xf32>
    %cst_106 = arith.constant dense<0.000000e+00> : vector<2x128xf32>
    %435 = tpu.matmul %427, %3, %cst_106 {dimension_numbers = #tpu.dot_dimension_numbers<[1], [0], [0], [1], [0, 0, 1, 1], [], []>} : vector<2x32xf32>, vector<32x128xf32>, vector<2x128xf32> -> vector<2x128xf32>
    %436 = arith.addf %434, %435 : vector<2x128xf32>
    %437 = vector.extract_strided_slice %436 {offsets = [0, 0], sizes = [2, 32], strides = [1, 1]} : vector<2x128xf32> to vector<2x32xf32>
    %438 = arith.negf %437 : vector<2x32xf32>
    %439 = math.exp %438 : vector<2x32xf32>
    %cst_107 = arith.constant 1.000000e+00 : f32
    %440 = vector.broadcast %cst_107 : f32 to vector<2x32xf32>
    %441 = arith.addf %440, %439 : vector<2x32xf32>
    %442 = arith.divf %440, %441 : vector<2x32xf32>
    %443 = vector.extract_strided_slice %436 {offsets = [0, 32], sizes = [2, 32], strides = [1, 1]} : vector<2x128xf32> to vector<2x32xf32>
    %444 = arith.negf %443 : vector<2x32xf32>
    %445 = math.exp %444 : vector<2x32xf32>
    %cst_108 = arith.constant 1.000000e+00 : f32
    %446 = vector.broadcast %cst_108 : f32 to vector<2x32xf32>
    %447 = arith.addf %446, %445 : vector<2x32xf32>
    %448 = arith.divf %446, %447 : vector<2x32xf32>
    %449 = vector.extract_strided_slice %436 {offsets = [0, 64], sizes = [2, 32], strides = [1, 1]} : vector<2x128xf32> to vector<2x32xf32>
    %450 = math.tanh %449 : vector<2x32xf32>
    %451 = vector.extract_strided_slice %436 {offsets = [0, 96], sizes = [2, 32], strides = [1, 1]} : vector<2x128xf32> to vector<2x32xf32>
    %452 = arith.negf %451 : vector<2x32xf32>
    %453 = math.exp %452 : vector<2x32xf32>
    %cst_109 = arith.constant 1.000000e+00 : f32
    %454 = vector.broadcast %cst_109 : f32 to vector<2x32xf32>
    %455 = arith.addf %454, %453 : vector<2x32xf32>
    %456 = arith.divf %454, %455 : vector<2x32xf32>
    %457 = arith.mulf %448, %430 : vector<2x32xf32>
    %458 = arith.mulf %442, %450 : vector<2x32xf32>
    %459 = arith.addf %457, %458 : vector<2x32xf32>
    %460 = math.tanh %459 : vector<2x32xf32>
    %461 = arith.mulf %456, %460 : vector<2x32xf32>
    %462 = vector.broadcast %431 : i32 to vector<2x1xi32>
    %463 = arith.cmpi slt, %462, %1 : vector<2x1xi32>
    %cst_110 = arith.constant 0.000000e+00 : f32
    %464 = vector.shape_cast %463 : vector<2x1xi1> to vector<2x1xi1>
    %465 = vector.broadcast %464 : vector<2x1xi1> to vector<2x32xi1>
    %466 = vector.broadcast %cst_110 : f32 to vector<2x32xf32>
    %467 = arith.select %465, %461, %466 : vector<2x32xi1>, vector<2x32xf32>
    %468 = arith.index_cast %431 : i32 to index
    %c0_111 = arith.constant 0 : index
    %c0_112 = arith.constant 0 : index
    %469 = vector.load %arg14[%468, %c0_111, %c0_112] : memref<8x2x32xf32, #tpu.memory_space<vmem>>, vector<1x2x32xf32>
    %470 = vector.shape_cast %469 : vector<1x2x32xf32> to vector<2x32xf32>
    %471 = vector.shape_cast %467 : vector<2x32xf32> to vector<1x2x32xf32>
    tpu.vector_store %arg14[%468, %c0_111, %c0_112], %471 {strides = array<i32>} : memref<8x2x32xf32, #tpu.memory_space<vmem>>, vector<1x2x32xf32>,
    %472 = vector.shape_cast %463 : vector<2x1xi1> to vector<2x1xi1>
    %473 = vector.broadcast %472 : vector<2x1xi1> to vector<2x32xi1>
    %474 = arith.select %473, %461, %427 : vector<2x32xi1>, vector<2x32xf32>
    %475 = vector.shape_cast %463 : vector<2x1xi1> to vector<2x1xi1>
    %476 = vector.broadcast %475 : vector<2x1xi1> to vector<2x32xi1>
    %477 = arith.select %476, %459, %430 : vector<2x32xi1>, vector<2x32xf32>
    %c2_i32_113 = arith.constant 2 : i32
    %c7_i32_114 = arith.constant 7 : i32
    %478 = arith.subi %c7_i32_114, %c2_i32_113 : i32
    %479 = arith.index_cast %478 : i32 to index
    %c0_115 = arith.constant 0 : index
    %c0_116 = arith.constant 0 : index
    %480 = vector.load %arg12[%479, %c0_115, %c0_116] : memref<8x2x128xf32, #tpu.memory_space<vmem>>, vector<1x2x128xf32>
    %481 = vector.shape_cast %480 : vector<1x2x128xf32> to vector<2x128xf32>
    %cst_117 = arith.constant dense<0.000000e+00> : vector<2x128xf32>
    %482 = tpu.matmul %474, %3, %cst_117 {dimension_numbers = #tpu.dot_dimension_numbers<[1], [0], [0], [1], [0, 0, 1, 1], [], []>} : vector<2x32xf32>, vector<32x128xf32>, vector<2x128xf32> -> vector<2x128xf32>
    %483 = arith.addf %481, %482 : vector<2x128xf32>
    %484 = vector.extract_strided_slice %483 {offsets = [0, 0], sizes = [2, 32], strides = [1, 1]} : vector<2x128xf32> to vector<2x32xf32>
    %485 = arith.negf %484 : vector<2x32xf32>
    %486 = math.exp %485 : vector<2x32xf32>
    %cst_118 = arith.constant 1.000000e+00 : f32
    %487 = vector.broadcast %cst_118 : f32 to vector<2x32xf32>
    %488 = arith.addf %487, %486 : vector<2x32xf32>
    %489 = arith.divf %487, %488 : vector<2x32xf32>
    %490 = vector.extract_strided_slice %483 {offsets = [0, 32], sizes = [2, 32], strides = [1, 1]} : vector<2x128xf32> to vector<2x32xf32>
    %491 = arith.negf %490 : vector<2x32xf32>
    %492 = math.exp %491 : vector<2x32xf32>
    %cst_119 = arith.constant 1.000000e+00 : f32
    %493 = vector.broadcast %cst_119 : f32 to vector<2x32xf32>
    %494 = arith.addf %493, %492 : vector<2x32xf32>
    %495 = arith.divf %493, %494 : vector<2x32xf32>
    %496 = vector.extract_strided_slice %483 {offsets = [0, 64], sizes = [2, 32], strides = [1, 1]} : vector<2x128xf32> to vector<2x32xf32>
    %497 = math.tanh %496 : vector<2x32xf32>
    %498 = vector.extract_strided_slice %483 {offsets = [0, 96], sizes = [2, 32], strides = [1, 1]} : vector<2x128xf32> to vector<2x32xf32>
    %499 = arith.negf %498 : vector<2x32xf32>
    %500 = math.exp %499 : vector<2x32xf32>
    %cst_120 = arith.constant 1.000000e+00 : f32
    %501 = vector.broadcast %cst_120 : f32 to vector<2x32xf32>
    %502 = arith.addf %501, %500 : vector<2x32xf32>
    %503 = arith.divf %501, %502 : vector<2x32xf32>
    %504 = arith.mulf %495, %477 : vector<2x32xf32>
    %505 = arith.mulf %489, %497 : vector<2x32xf32>
    %506 = arith.addf %504, %505 : vector<2x32xf32>
    %507 = math.tanh %506 : vector<2x32xf32>
    %508 = arith.mulf %503, %507 : vector<2x32xf32>
    %509 = vector.broadcast %478 : i32 to vector<2x1xi32>
    %510 = arith.cmpi slt, %509, %1 : vector<2x1xi32>
    %cst_121 = arith.constant 0.000000e+00 : f32
    %511 = vector.shape_cast %510 : vector<2x1xi1> to vector<2x1xi1>
    %512 = vector.broadcast %511 : vector<2x1xi1> to vector<2x32xi1>
    %513 = vector.broadcast %cst_121 : f32 to vector<2x32xf32>
    %514 = arith.select %512, %508, %513 : vector<2x32xi1>, vector<2x32xf32>
    %515 = arith.index_cast %478 : i32 to index
    %c0_122 = arith.constant 0 : index
    %c0_123 = arith.constant 0 : index
    %516 = vector.load %arg14[%515, %c0_122, %c0_123] : memref<8x2x32xf32, #tpu.memory_space<vmem>>, vector<1x2x32xf32>
    %517 = vector.shape_cast %516 : vector<1x2x32xf32> to vector<2x32xf32>
    %518 = vector.shape_cast %514 : vector<2x32xf32> to vector<1x2x32xf32>
    tpu.vector_store %arg14[%515, %c0_122, %c0_123], %518 {strides = array<i32>} : memref<8x2x32xf32, #tpu.memory_space<vmem>>, vector<1x2x32xf32>,
    %519 = vector.shape_cast %510 : vector<2x1xi1> to vector<2x1xi1>
    %520 = vector.broadcast %519 : vector<2x1xi1> to vector<2x32xi1>
    %521 = arith.select %520, %508, %474 : vector<2x32xi1>, vector<2x32xf32>
    %522 = vector.shape_cast %510 : vector<2x1xi1> to vector<2x1xi1>
    %523 = vector.broadcast %522 : vector<2x1xi1> to vector<2x32xi1>
    %524 = arith.select %523, %506, %477 : vector<2x32xi1>, vector<2x32xf32>
    %c3_i32_124 = arith.constant 3 : i32
    %c7_i32_125 = arith.constant 7 : i32
    %525 = arith.subi %c7_i32_125, %c3_i32_124 : i32
    %526 = arith.index_cast %525 : i32 to index
    %c0_126 = arith.constant 0 : index
    %c0_127 = arith.constant 0 : index
    %527 = vector.load %arg12[%526, %c0_126, %c0_127] : memref<8x2x128xf32, #tpu.memory_space<vmem>>, vector<1x2x128xf32>
    %528 = vector.shape_cast %527 : vector<1x2x128xf32> to vector<2x128xf32>
    %cst_128 = arith.constant dense<0.000000e+00> : vector<2x128xf32>
    %529 = tpu.matmul %521, %3, %cst_128 {dimension_numbers = #tpu.dot_dimension_numbers<[1], [0], [0], [1], [0, 0, 1, 1], [], []>} : vector<2x32xf32>, vector<32x128xf32>, vector<2x128xf32> -> vector<2x128xf32>
    %530 = arith.addf %528, %529 : vector<2x128xf32>
    %531 = vector.extract_strided_slice %530 {offsets = [0, 0], sizes = [2, 32], strides = [1, 1]} : vector<2x128xf32> to vector<2x32xf32>
    %532 = arith.negf %531 : vector<2x32xf32>
    %533 = math.exp %532 : vector<2x32xf32>
    %cst_129 = arith.constant 1.000000e+00 : f32
    %534 = vector.broadcast %cst_129 : f32 to vector<2x32xf32>
    %535 = arith.addf %534, %533 : vector<2x32xf32>
    %536 = arith.divf %534, %535 : vector<2x32xf32>
    %537 = vector.extract_strided_slice %530 {offsets = [0, 32], sizes = [2, 32], strides = [1, 1]} : vector<2x128xf32> to vector<2x32xf32>
    %538 = arith.negf %537 : vector<2x32xf32>
    %539 = math.exp %538 : vector<2x32xf32>
    %cst_130 = arith.constant 1.000000e+00 : f32
    %540 = vector.broadcast %cst_130 : f32 to vector<2x32xf32>
    %541 = arith.addf %540, %539 : vector<2x32xf32>
    %542 = arith.divf %540, %541 : vector<2x32xf32>
    %543 = vector.extract_strided_slice %530 {offsets = [0, 64], sizes = [2, 32], strides = [1, 1]} : vector<2x128xf32> to vector<2x32xf32>
    %544 = math.tanh %543 : vector<2x32xf32>
    %545 = vector.extract_strided_slice %530 {offsets = [0, 96], sizes = [2, 32], strides = [1, 1]} : vector<2x128xf32> to vector<2x32xf32>
    %546 = arith.negf %545 : vector<2x32xf32>
    %547 = math.exp %546 : vector<2x32xf32>
    %cst_131 = arith.constant 1.000000e+00 : f32
    %548 = vector.broadcast %cst_131 : f32 to vector<2x32xf32>
    %549 = arith.addf %548, %547 : vector<2x32xf32>
    %550 = arith.divf %548, %549 : vector<2x32xf32>
    %551 = arith.mulf %542, %524 : vector<2x32xf32>
    %552 = arith.mulf %536, %544 : vector<2x32xf32>
    %553 = arith.addf %551, %552 : vector<2x32xf32>
    %554 = math.tanh %553 : vector<2x32xf32>
    %555 = arith.mulf %550, %554 : vector<2x32xf32>
    %556 = vector.broadcast %525 : i32 to vector<2x1xi32>
    %557 = arith.cmpi slt, %556, %1 : vector<2x1xi32>
    %cst_132 = arith.constant 0.000000e+00 : f32
    %558 = vector.shape_cast %557 : vector<2x1xi1> to vector<2x1xi1>
    %559 = vector.broadcast %558 : vector<2x1xi1> to vector<2x32xi1>
    %560 = vector.broadcast %cst_132 : f32 to vector<2x32xf32>
    %561 = arith.select %559, %555, %560 : vector<2x32xi1>, vector<2x32xf32>
    %562 = arith.index_cast %525 : i32 to index
    %c0_133 = arith.constant 0 : index
    %c0_134 = arith.constant 0 : index
    %563 = vector.load %arg14[%562, %c0_133, %c0_134] : memref<8x2x32xf32, #tpu.memory_space<vmem>>, vector<1x2x32xf32>
    %564 = vector.shape_cast %563 : vector<1x2x32xf32> to vector<2x32xf32>
    %565 = vector.shape_cast %561 : vector<2x32xf32> to vector<1x2x32xf32>
    tpu.vector_store %arg14[%562, %c0_133, %c0_134], %565 {strides = array<i32>} : memref<8x2x32xf32, #tpu.memory_space<vmem>>, vector<1x2x32xf32>,
    %566 = vector.shape_cast %557 : vector<2x1xi1> to vector<2x1xi1>
    %567 = vector.broadcast %566 : vector<2x1xi1> to vector<2x32xi1>
    %568 = arith.select %567, %555, %521 : vector<2x32xi1>, vector<2x32xf32>
    %569 = vector.shape_cast %557 : vector<2x1xi1> to vector<2x1xi1>
    %570 = vector.broadcast %569 : vector<2x1xi1> to vector<2x32xi1>
    %571 = arith.select %570, %553, %524 : vector<2x32xi1>, vector<2x32xf32>
    %c4_i32_135 = arith.constant 4 : i32
    %c7_i32_136 = arith.constant 7 : i32
    %572 = arith.subi %c7_i32_136, %c4_i32_135 : i32
    %573 = arith.index_cast %572 : i32 to index
    %c0_137 = arith.constant 0 : index
    %c0_138 = arith.constant 0 : index
    %574 = vector.load %arg12[%573, %c0_137, %c0_138] : memref<8x2x128xf32, #tpu.memory_space<vmem>>, vector<1x2x128xf32>
    %575 = vector.shape_cast %574 : vector<1x2x128xf32> to vector<2x128xf32>
    %cst_139 = arith.constant dense<0.000000e+00> : vector<2x128xf32>
    %576 = tpu.matmul %568, %3, %cst_139 {dimension_numbers = #tpu.dot_dimension_numbers<[1], [0], [0], [1], [0, 0, 1, 1], [], []>} : vector<2x32xf32>, vector<32x128xf32>, vector<2x128xf32> -> vector<2x128xf32>
    %577 = arith.addf %575, %576 : vector<2x128xf32>
    %578 = vector.extract_strided_slice %577 {offsets = [0, 0], sizes = [2, 32], strides = [1, 1]} : vector<2x128xf32> to vector<2x32xf32>
    %579 = arith.negf %578 : vector<2x32xf32>
    %580 = math.exp %579 : vector<2x32xf32>
    %cst_140 = arith.constant 1.000000e+00 : f32
    %581 = vector.broadcast %cst_140 : f32 to vector<2x32xf32>
    %582 = arith.addf %581, %580 : vector<2x32xf32>
    %583 = arith.divf %581, %582 : vector<2x32xf32>
    %584 = vector.extract_strided_slice %577 {offsets = [0, 32], sizes = [2, 32], strides = [1, 1]} : vector<2x128xf32> to vector<2x32xf32>
    %585 = arith.negf %584 : vector<2x32xf32>
    %586 = math.exp %585 : vector<2x32xf32>
    %cst_141 = arith.constant 1.000000e+00 : f32
    %587 = vector.broadcast %cst_141 : f32 to vector<2x32xf32>
    %588 = arith.addf %587, %586 : vector<2x32xf32>
    %589 = arith.divf %587, %588 : vector<2x32xf32>
    %590 = vector.extract_strided_slice %577 {offsets = [0, 64], sizes = [2, 32], strides = [1, 1]} : vector<2x128xf32> to vector<2x32xf32>
    %591 = math.tanh %590 : vector<2x32xf32>
    %592 = vector.extract_strided_slice %577 {offsets = [0, 96], sizes = [2, 32], strides = [1, 1]} : vector<2x128xf32> to vector<2x32xf32>
    %593 = arith.negf %592 : vector<2x32xf32>
    %594 = math.exp %593 : vector<2x32xf32>
    %cst_142 = arith.constant 1.000000e+00 : f32
    %595 = vector.broadcast %cst_142 : f32 to vector<2x32xf32>
    %596 = arith.addf %595, %594 : vector<2x32xf32>
    %597 = arith.divf %595, %596 : vector<2x32xf32>
    %598 = arith.mulf %589, %571 : vector<2x32xf32>
    %599 = arith.mulf %583, %591 : vector<2x32xf32>
    %600 = arith.addf %598, %599 : vector<2x32xf32>
    %601 = math.tanh %600 : vector<2x32xf32>
    %602 = arith.mulf %597, %601 : vector<2x32xf32>
    %603 = vector.broadcast %572 : i32 to vector<2x1xi32>
    %604 = arith.cmpi slt, %603, %1 : vector<2x1xi32>
    %cst_143 = arith.constant 0.000000e+00 : f32
    %605 = vector.shape_cast %604 : vector<2x1xi1> to vector<2x1xi1>
    %606 = vector.broadcast %605 : vector<2x1xi1> to vector<2x32xi1>
    %607 = vector.broadcast %cst_143 : f32 to vector<2x32xf32>
    %608 = arith.select %606, %602, %607 : vector<2x32xi1>, vector<2x32xf32>
    %609 = arith.index_cast %572 : i32 to index
    %c0_144 = arith.constant 0 : index
    %c0_145 = arith.constant 0 : index
    %610 = vector.load %arg14[%609, %c0_144, %c0_145] : memref<8x2x32xf32, #tpu.memory_space<vmem>>, vector<1x2x32xf32>
    %611 = vector.shape_cast %610 : vector<1x2x32xf32> to vector<2x32xf32>
    %612 = vector.shape_cast %608 : vector<2x32xf32> to vector<1x2x32xf32>
    tpu.vector_store %arg14[%609, %c0_144, %c0_145], %612 {strides = array<i32>} : memref<8x2x32xf32, #tpu.memory_space<vmem>>, vector<1x2x32xf32>,
    %613 = vector.shape_cast %604 : vector<2x1xi1> to vector<2x1xi1>
    %614 = vector.broadcast %613 : vector<2x1xi1> to vector<2x32xi1>
    %615 = arith.select %614, %602, %568 : vector<2x32xi1>, vector<2x32xf32>
    %616 = vector.shape_cast %604 : vector<2x1xi1> to vector<2x1xi1>
    %617 = vector.broadcast %616 : vector<2x1xi1> to vector<2x32xi1>
    %618 = arith.select %617, %600, %571 : vector<2x32xi1>, vector<2x32xf32>
    %c5_i32_146 = arith.constant 5 : i32
    %c7_i32_147 = arith.constant 7 : i32
    %619 = arith.subi %c7_i32_147, %c5_i32_146 : i32
    %620 = arith.index_cast %619 : i32 to index
    %c0_148 = arith.constant 0 : index
    %c0_149 = arith.constant 0 : index
    %621 = vector.load %arg12[%620, %c0_148, %c0_149] : memref<8x2x128xf32, #tpu.memory_space<vmem>>, vector<1x2x128xf32>
    %622 = vector.shape_cast %621 : vector<1x2x128xf32> to vector<2x128xf32>
    %cst_150 = arith.constant dense<0.000000e+00> : vector<2x128xf32>
    %623 = tpu.matmul %615, %3, %cst_150 {dimension_numbers = #tpu.dot_dimension_numbers<[1], [0], [0], [1], [0, 0, 1, 1], [], []>} : vector<2x32xf32>, vector<32x128xf32>, vector<2x128xf32> -> vector<2x128xf32>
    %624 = arith.addf %622, %623 : vector<2x128xf32>
    %625 = vector.extract_strided_slice %624 {offsets = [0, 0], sizes = [2, 32], strides = [1, 1]} : vector<2x128xf32> to vector<2x32xf32>
    %626 = arith.negf %625 : vector<2x32xf32>
    %627 = math.exp %626 : vector<2x32xf32>
    %cst_151 = arith.constant 1.000000e+00 : f32
    %628 = vector.broadcast %cst_151 : f32 to vector<2x32xf32>
    %629 = arith.addf %628, %627 : vector<2x32xf32>
    %630 = arith.divf %628, %629 : vector<2x32xf32>
    %631 = vector.extract_strided_slice %624 {offsets = [0, 32], sizes = [2, 32], strides = [1, 1]} : vector<2x128xf32> to vector<2x32xf32>
    %632 = arith.negf %631 : vector<2x32xf32>
    %633 = math.exp %632 : vector<2x32xf32>
    %cst_152 = arith.constant 1.000000e+00 : f32
    %634 = vector.broadcast %cst_152 : f32 to vector<2x32xf32>
    %635 = arith.addf %634, %633 : vector<2x32xf32>
    %636 = arith.divf %634, %635 : vector<2x32xf32>
    %637 = vector.extract_strided_slice %624 {offsets = [0, 64], sizes = [2, 32], strides = [1, 1]} : vector<2x128xf32> to vector<2x32xf32>
    %638 = math.tanh %637 : vector<2x32xf32>
    %639 = vector.extract_strided_slice %624 {offsets = [0, 96], sizes = [2, 32], strides = [1, 1]} : vector<2x128xf32> to vector<2x32xf32>
    %640 = arith.negf %639 : vector<2x32xf32>
    %641 = math.exp %640 : vector<2x32xf32>
    %cst_153 = arith.constant 1.000000e+00 : f32
    %642 = vector.broadcast %cst_153 : f32 to vector<2x32xf32>
    %643 = arith.addf %642, %641 : vector<2x32xf32>
    %644 = arith.divf %642, %643 : vector<2x32xf32>
    %645 = arith.mulf %636, %618 : vector<2x32xf32>
    %646 = arith.mulf %630, %638 : vector<2x32xf32>
    %647 = arith.addf %645, %646 : vector<2x32xf32>
    %648 = math.tanh %647 : vector<2x32xf32>
    %649 = arith.mulf %644, %648 : vector<2x32xf32>
    %650 = vector.broadcast %619 : i32 to vector<2x1xi32>
    %651 = arith.cmpi slt, %650, %1 : vector<2x1xi32>
    %cst_154 = arith.constant 0.000000e+00 : f32
    %652 = vector.shape_cast %651 : vector<2x1xi1> to vector<2x1xi1>
    %653 = vector.broadcast %652 : vector<2x1xi1> to vector<2x32xi1>
    %654 = vector.broadcast %cst_154 : f32 to vector<2x32xf32>
    %655 = arith.select %653, %649, %654 : vector<2x32xi1>, vector<2x32xf32>
    %656 = arith.index_cast %619 : i32 to index
    %c0_155 = arith.constant 0 : index
    %c0_156 = arith.constant 0 : index
    %657 = vector.load %arg14[%656, %c0_155, %c0_156] : memref<8x2x32xf32, #tpu.memory_space<vmem>>, vector<1x2x32xf32>
    %658 = vector.shape_cast %657 : vector<1x2x32xf32> to vector<2x32xf32>
    %659 = vector.shape_cast %655 : vector<2x32xf32> to vector<1x2x32xf32>
    tpu.vector_store %arg14[%656, %c0_155, %c0_156], %659 {strides = array<i32>} : memref<8x2x32xf32, #tpu.memory_space<vmem>>, vector<1x2x32xf32>,
    %660 = vector.shape_cast %651 : vector<2x1xi1> to vector<2x1xi1>
    %661 = vector.broadcast %660 : vector<2x1xi1> to vector<2x32xi1>
    %662 = arith.select %661, %649, %615 : vector<2x32xi1>, vector<2x32xf32>
    %663 = vector.shape_cast %651 : vector<2x1xi1> to vector<2x1xi1>
    %664 = vector.broadcast %663 : vector<2x1xi1> to vector<2x32xi1>
    %665 = arith.select %664, %647, %618 : vector<2x32xi1>, vector<2x32xf32>
    %c6_i32_157 = arith.constant 6 : i32
    %c7_i32_158 = arith.constant 7 : i32
    %666 = arith.subi %c7_i32_158, %c6_i32_157 : i32
    %667 = arith.index_cast %666 : i32 to index
    %c0_159 = arith.constant 0 : index
    %c0_160 = arith.constant 0 : index
    %668 = vector.load %arg12[%667, %c0_159, %c0_160] : memref<8x2x128xf32, #tpu.memory_space<vmem>>, vector<1x2x128xf32>
    %669 = vector.shape_cast %668 : vector<1x2x128xf32> to vector<2x128xf32>
    %cst_161 = arith.constant dense<0.000000e+00> : vector<2x128xf32>
    %670 = tpu.matmul %662, %3, %cst_161 {dimension_numbers = #tpu.dot_dimension_numbers<[1], [0], [0], [1], [0, 0, 1, 1], [], []>} : vector<2x32xf32>, vector<32x128xf32>, vector<2x128xf32> -> vector<2x128xf32>
    %671 = arith.addf %669, %670 : vector<2x128xf32>
    %672 = vector.extract_strided_slice %671 {offsets = [0, 0], sizes = [2, 32], strides = [1, 1]} : vector<2x128xf32> to vector<2x32xf32>
    %673 = arith.negf %672 : vector<2x32xf32>
    %674 = math.exp %673 : vector<2x32xf32>
    %cst_162 = arith.constant 1.000000e+00 : f32
    %675 = vector.broadcast %cst_162 : f32 to vector<2x32xf32>
    %676 = arith.addf %675, %674 : vector<2x32xf32>
    %677 = arith.divf %675, %676 : vector<2x32xf32>
    %678 = vector.extract_strided_slice %671 {offsets = [0, 32], sizes = [2, 32], strides = [1, 1]} : vector<2x128xf32> to vector<2x32xf32>
    %679 = arith.negf %678 : vector<2x32xf32>
    %680 = math.exp %679 : vector<2x32xf32>
    %cst_163 = arith.constant 1.000000e+00 : f32
    %681 = vector.broadcast %cst_163 : f32 to vector<2x32xf32>
    %682 = arith.addf %681, %680 : vector<2x32xf32>
    %683 = arith.divf %681, %682 : vector<2x32xf32>
    %684 = vector.extract_strided_slice %671 {offsets = [0, 64], sizes = [2, 32], strides = [1, 1]} : vector<2x128xf32> to vector<2x32xf32>
    %685 = math.tanh %684 : vector<2x32xf32>
    %686 = vector.extract_strided_slice %671 {offsets = [0, 96], sizes = [2, 32], strides = [1, 1]} : vector<2x128xf32> to vector<2x32xf32>
    %687 = arith.negf %686 : vector<2x32xf32>
    %688 = math.exp %687 : vector<2x32xf32>
    %cst_164 = arith.constant 1.000000e+00 : f32
    %689 = vector.broadcast %cst_164 : f32 to vector<2x32xf32>
    %690 = arith.addf %689, %688 : vector<2x32xf32>
    %691 = arith.divf %689, %690 : vector<2x32xf32>
    %692 = arith.mulf %683, %665 : vector<2x32xf32>
    %693 = arith.mulf %677, %685 : vector<2x32xf32>
    %694 = arith.addf %692, %693 : vector<2x32xf32>
    %695 = math.tanh %694 : vector<2x32xf32>
    %696 = arith.mulf %691, %695 : vector<2x32xf32>
    %697 = vector.broadcast %666 : i32 to vector<2x1xi32>
    %698 = arith.cmpi slt, %697, %1 : vector<2x1xi32>
    %cst_165 = arith.constant 0.000000e+00 : f32
    %699 = vector.shape_cast %698 : vector<2x1xi1> to vector<2x1xi1>
    %700 = vector.broadcast %699 : vector<2x1xi1> to vector<2x32xi1>
    %701 = vector.broadcast %cst_165 : f32 to vector<2x32xf32>
    %702 = arith.select %700, %696, %701 : vector<2x32xi1>, vector<2x32xf32>
    %703 = arith.index_cast %666 : i32 to index
    %c0_166 = arith.constant 0 : index
    %c0_167 = arith.constant 0 : index
    %704 = vector.load %arg14[%703, %c0_166, %c0_167] : memref<8x2x32xf32, #tpu.memory_space<vmem>>, vector<1x2x32xf32>
    %705 = vector.shape_cast %704 : vector<1x2x32xf32> to vector<2x32xf32>
    %706 = vector.shape_cast %702 : vector<2x32xf32> to vector<1x2x32xf32>
    tpu.vector_store %arg14[%703, %c0_166, %c0_167], %706 {strides = array<i32>} : memref<8x2x32xf32, #tpu.memory_space<vmem>>, vector<1x2x32xf32>,
    %707 = vector.shape_cast %698 : vector<2x1xi1> to vector<2x1xi1>
    %708 = vector.broadcast %707 : vector<2x1xi1> to vector<2x32xi1>
    %709 = arith.select %708, %696, %662 : vector<2x32xi1>, vector<2x32xf32>
    %710 = vector.shape_cast %698 : vector<2x1xi1> to vector<2x1xi1>
    %711 = vector.broadcast %710 : vector<2x1xi1> to vector<2x32xi1>
    %712 = arith.select %711, %694, %665 : vector<2x32xi1>, vector<2x32xf32>
    %c7_i32_168 = arith.constant 7 : i32
    %c7_i32_169 = arith.constant 7 : i32
    %713 = arith.subi %c7_i32_169, %c7_i32_168 : i32
    %714 = arith.index_cast %713 : i32 to index
    %c0_170 = arith.constant 0 : index
    %c0_171 = arith.constant 0 : index
    %715 = vector.load %arg12[%714, %c0_170, %c0_171] : memref<8x2x128xf32, #tpu.memory_space<vmem>>, vector<1x2x128xf32>
    %716 = vector.shape_cast %715 : vector<1x2x128xf32> to vector<2x128xf32>
    %cst_172 = arith.constant dense<0.000000e+00> : vector<2x128xf32>
    %717 = tpu.matmul %709, %3, %cst_172 {dimension_numbers = #tpu.dot_dimension_numbers<[1], [0], [0], [1], [0, 0, 1, 1], [], []>} : vector<2x32xf32>, vector<32x128xf32>, vector<2x128xf32> -> vector<2x128xf32>
    %718 = arith.addf %716, %717 : vector<2x128xf32>
    %719 = vector.extract_strided_slice %718 {offsets = [0, 0], sizes = [2, 32], strides = [1, 1]} : vector<2x128xf32> to vector<2x32xf32>
    %720 = arith.negf %719 : vector<2x32xf32>
    %721 = math.exp %720 : vector<2x32xf32>
    %cst_173 = arith.constant 1.000000e+00 : f32
    %722 = vector.broadcast %cst_173 : f32 to vector<2x32xf32>
    %723 = arith.addf %722, %721 : vector<2x32xf32>
    %724 = arith.divf %722, %723 : vector<2x32xf32>
    %725 = vector.extract_strided_slice %718 {offsets = [0, 32], sizes = [2, 32], strides = [1, 1]} : vector<2x128xf32> to vector<2x32xf32>
    %726 = arith.negf %725 : vector<2x32xf32>
    %727 = math.exp %726 : vector<2x32xf32>
    %cst_174 = arith.constant 1.000000e+00 : f32
    %728 = vector.broadcast %cst_174 : f32 to vector<2x32xf32>
    %729 = arith.addf %728, %727 : vector<2x32xf32>
    %730 = arith.divf %728, %729 : vector<2x32xf32>
    %731 = vector.extract_strided_slice %718 {offsets = [0, 64], sizes = [2, 32], strides = [1, 1]} : vector<2x128xf32> to vector<2x32xf32>
    %732 = math.tanh %731 : vector<2x32xf32>
    %733 = vector.extract_strided_slice %718 {offsets = [0, 96], sizes = [2, 32], strides = [1, 1]} : vector<2x128xf32> to vector<2x32xf32>
    %734 = arith.negf %733 : vector<2x32xf32>
    %735 = math.exp %734 : vector<2x32xf32>
    %cst_175 = arith.constant 1.000000e+00 : f32
    %736 = vector.broadcast %cst_175 : f32 to vector<2x32xf32>
    %737 = arith.addf %736, %735 : vector<2x32xf32>
    %738 = arith.divf %736, %737 : vector<2x32xf32>
    %739 = arith.mulf %730, %712 : vector<2x32xf32>
    %740 = arith.mulf %724, %732 : vector<2x32xf32>
    %741 = arith.addf %739, %740 : vector<2x32xf32>
    %742 = math.tanh %741 : vector<2x32xf32>
    %743 = arith.mulf %738, %742 : vector<2x32xf32>
    %744 = vector.broadcast %713 : i32 to vector<2x1xi32>
    %745 = arith.cmpi slt, %744, %1 : vector<2x1xi32>
    %cst_176 = arith.constant 0.000000e+00 : f32
    %746 = vector.shape_cast %745 : vector<2x1xi1> to vector<2x1xi1>
    %747 = vector.broadcast %746 : vector<2x1xi1> to vector<2x32xi1>
    %748 = vector.broadcast %cst_176 : f32 to vector<2x32xf32>
    %749 = arith.select %747, %743, %748 : vector<2x32xi1>, vector<2x32xf32>
    %750 = arith.index_cast %713 : i32 to index
    %c0_177 = arith.constant 0 : index
    %c0_178 = arith.constant 0 : index
    %751 = vector.load %arg14[%750, %c0_177, %c0_178] : memref<8x2x32xf32, #tpu.memory_space<vmem>>, vector<1x2x32xf32>
    %752 = vector.shape_cast %751 : vector<1x2x32xf32> to vector<2x32xf32>
    %753 = vector.shape_cast %749 : vector<2x32xf32> to vector<1x2x32xf32>
    tpu.vector_store %arg14[%750, %c0_177, %c0_178], %753 {strides = array<i32>} : memref<8x2x32xf32, #tpu.memory_space<vmem>>, vector<1x2x32xf32>,
    %754 = vector.shape_cast %745 : vector<2x1xi1> to vector<2x1xi1>
    %755 = vector.broadcast %754 : vector<2x1xi1> to vector<2x32xi1>
    %756 = arith.select %755, %743, %709 : vector<2x32xi1>, vector<2x32xf32>
    %757 = vector.shape_cast %745 : vector<2x1xi1> to vector<2x1xi1>
    %758 = vector.broadcast %757 : vector<2x1xi1> to vector<2x32xi1>
    %759 = arith.select %758, %741, %712 : vector<2x32xi1>, vector<2x32xf32>
    %c8_i32_179 = arith.constant 8 : i32
    %c0_180 = arith.constant 0 : index
    %c0_181 = arith.constant 0 : index
    %c0_182 = arith.constant 0 : index
    %760 = vector.load %arg13[%c0_180, %c0_181, %c0_182] : memref<8x2x32xf32, #tpu.memory_space<vmem>>, vector<8x2x32xf32>
    %761 = vector.shape_cast %760 : vector<8x2x32xf32> to vector<16x32xf32>
    %c0_183 = arith.constant 0 : index
    %c0_184 = arith.constant 0 : index
    %c0_185 = arith.constant 0 : index
    %762 = vector.load %arg14[%c0_183, %c0_184, %c0_185] : memref<8x2x32xf32, #tpu.memory_space<vmem>>, vector<8x2x32xf32>
    %763 = vector.shape_cast %762 : vector<8x2x32xf32> to vector<16x32xf32>
    %c0_186 = arith.constant 0 : index
    %c0_187 = arith.constant 0 : index
    %764 = vector.load %arg7[%c0_186, %c0_187] : memref<32x32xf32, #tpu.memory_space<vmem>>, vector<32x32xf32>
    %cst_188 = arith.constant dense<0.000000e+00> : vector<16x32xf32>
    %765 = tpu.matmul %761, %764, %cst_188 {dimension_numbers = #tpu.dot_dimension_numbers<[1], [0], [0], [1], [0, 0, 1, 1], [], []>} : vector<16x32xf32>, vector<32x32xf32>, vector<16x32xf32> -> vector<16x32xf32>
    %c0_189 = arith.constant 0 : index
    %c0_190 = arith.constant 0 : index
    %766 = vector.load %arg8[%c0_189, %c0_190] : memref<32x32xf32, #tpu.memory_space<vmem>>, vector<32x32xf32>
    %cst_191 = arith.constant dense<0.000000e+00> : vector<16x32xf32>
    %767 = tpu.matmul %763, %766, %cst_191 {dimension_numbers = #tpu.dot_dimension_numbers<[1], [0], [0], [1], [0, 0, 1, 1], [], []>} : vector<16x32xf32>, vector<32x32xf32>, vector<16x32xf32> -> vector<16x32xf32>
    %768 = arith.addf %765, %767 : vector<16x32xf32>
    %c0_192 = arith.constant 0 : index
    %c0_193 = arith.constant 0 : index
    %769 = vector.load %arg9[%c0_192, %c0_193] : memref<1x32xf32, #tpu.memory_space<vmem>>, vector<1x32xf32>
    %770 = vector.broadcast %769 : vector<1x32xf32> to vector<16x32xf32>
    %771 = arith.addf %768, %770 : vector<16x32xf32>
    %772 = vector.shape_cast %771 : vector<16x32xf32> to vector<8x2x32xf32>
    %773 = arith.addf %772, %0 : vector<8x2x32xf32>
    %c0_194 = arith.constant 0 : index
    %c0_195 = arith.constant 0 : index
    %c0_196 = arith.constant 0 : index
    %774 = vector.load %arg10[%c0_194, %c0_195, %c0_196] : memref<8x2x32xf32, #tpu.memory_space<vmem>>, vector<8x2x32xf32>
    tpu.vector_store %arg10[%c0_194, %c0_195, %c0_196], %773 {strides = array<i32>} : memref<8x2x32xf32, #tpu.memory_space<vmem>>, vector<8x2x32xf32>,
    return
  }
  func.func @transform_0(%arg0: i32) -> (i32, i32) {
    %c0_i32 = arith.constant 0 : i32
    %c0_i32_0 = arith.constant 0 : i32
    return %arg0, %c0_i32 : i32, i32
  }
  func.func @transform_1(%arg0: i32) -> (i32, i32, i32) {
    %c0_i32 = arith.constant 0 : i32
    %c0_i32_0 = arith.constant 0 : i32
    %c0_i32_1 = arith.constant 0 : i32
    return %c0_i32, %arg0, %c0_i32_0 : i32, i32, i32
  }
  func.func @transform_2(%arg0: i32) -> (i32, i32) {
    %c0_i32 = arith.constant 0 : i32
    %c0_i32_0 = arith.constant 0 : i32
    %c0_i32_1 = arith.constant 0 : i32
    return %c0_i32, %c0_i32_0 : i32, i32
  }
  func.func @transform_3(%arg0: i32) -> (i32, i32) {
    %c0_i32 = arith.constant 0 : i32
    %c0_i32_0 = arith.constant 0 : i32
    %c0_i32_1 = arith.constant 0 : i32
    return %c0_i32, %c0_i32_0 : i32, i32
  }
  func.func @transform_4(%arg0: i32) -> (i32, i32) {
    %c0_i32 = arith.constant 0 : i32
    %c0_i32_0 = arith.constant 0 : i32
    %c0_i32_1 = arith.constant 0 : i32
    return %c0_i32, %c0_i32_0 : i32, i32
  }
  func.func @transform_5(%arg0: i32) -> (i32, i32) {
    %c0_i32 = arith.constant 0 : i32
    %c0_i32_0 = arith.constant 0 : i32
    %c0_i32_1 = arith.constant 0 : i32
    return %c0_i32, %c0_i32_0 : i32, i32
  }
  func.func @transform_6(%arg0: i32) -> (i32, i32) {
    %c0_i32 = arith.constant 0 : i32
    %c0_i32_0 = arith.constant 0 : i32
    %c0_i32_1 = arith.constant 0 : i32
    return %c0_i32, %c0_i32_0 : i32, i32
  }
  func.func @transform_7(%arg0: i32) -> (i32, i32) {
    %c0_i32 = arith.constant 0 : i32
    %c0_i32_0 = arith.constant 0 : i32
    %c0_i32_1 = arith.constant 0 : i32
    return %c0_i32, %c0_i32_0 : i32, i32
  }
  func.func @transform_8(%arg0: i32) -> (i32, i32) {
    %c0_i32 = arith.constant 0 : i32
    %c0_i32_0 = arith.constant 0 : i32
    %c0_i32_1 = arith.constant 0 : i32
    return %c0_i32, %c0_i32_0 : i32, i32
  }
  func.func @transform_9(%arg0: i32) -> (i32, i32, i32) {
    %c0_i32 = arith.constant 0 : i32
    %c0_i32_0 = arith.constant 0 : i32
    %c0_i32_1 = arith.constant 0 : i32
    return %c0_i32, %arg0, %c0_i32_0 : i32, i32, i32
  }
}

</mosaic_0001>

<bundles_post_ra>
// kernel: tpu_custom_call.1
= control target key start
LH: loop header
LB: loop body
LE: loop exit
PB: predicated region body
PF: predicated region fallthrough
CT: control target
= control target key end

     0   :  { %14 = vsyncpa [#allocation7], 0  ;;  %s4002_s0 = inlined_call_operand.vmem [shape: s32[2,1], index: 0, kind: input, shape index: {}]   ;;  %s4003_s1 = inlined_call_operand.hbm [shape: f32[8,2,32], index: 1, kind: input, shape index: {}]   ;;  %s4004_s2 = inlined_call_operand.hbm [shape: f32[32,256], index: 2, kind: input, shape index: {}]   ;;  %s4005_s3 = inlined_call_operand.vmem [shape: f32[1,256], index: 3, kind: input, shape index: {}]   ;;  %s4006_s4 = inlined_call_operand.hbm [shape: f32[32,128], index: 4, kind: input, shape index: {}]   ;;  %s4007_s5 = inlined_call_operand.hbm [shape: f32[32,128], index: 5, kind: input, shape index: {}]   ;;  %s4008_s6 = inlined_call_operand.hbm [shape: f32[32,32], index: 6, kind: input, shape index: {}]   ;;  %s4009_s7 = inlined_call_operand.hbm [shape: f32[32,32], index: 7, kind: input, shape index: {}]   ;;  %s4010_s8 = inlined_call_operand.vmem [shape: f32[1,32], index: 8, kind: input, shape index: {}]   ;;  %s4011_s9 = inlined_call_operand.hbm [shape: f32[8,2,32], index: 9, kind: output, shape index: {}]  }
   0x1   :  { %15 = vsyncpa [#allocation10], 0 }
   0x2   :  { %16 = vsyncpa [#allocation13], 0 }
   0x3   :  { %17 = vsyncpa [#allocation16], 0 }
   0x4   :  { %18 = vsyncpa [#allocation8], 0  ;;  %s3343_s30 = smov [#allocation9]   ;;  %s3179_s13 = scalar_lea.hbm %s4004_s2, 1024 }
   0x5   :  { %s38_s10 = sshll.u32 %s3343_s30, 4  ;;  %p3180_p0 = scmp.ne.s32.totalorder %s4004_s2, %s3179_s13  ;;  %s39_s10 = int_to_ptr.vmem [resolvable:$true] %s38_s10 }
   0x6   :  { %p3183_p1 = scmp.lt.u32.totalorder %s3179_s13, %s4004_s2 }
   0x8   :  { %p3185_p2 = pnand %p3183_p1, %p3180_p0 }
   0xa   :  { %3188 = shalt.err (!%p3185_p2)
}
   0xb   :  { %s3189_s18 = scalar_lea.vmem %s39_s10, 1024  ;;  %p3194_p4 = scmp.lt.s32.totalorder %s39_s10, %s39_s10 }
   0xc   :  { %p3190_p3 = scmp.ne.s32.totalorder %s39_s10, %s3189_s18  ;;  %p3195_p5 = scmp.lt.s32.totalorder %s3189_s18, %s3189_s18 }
   0xe   :  { %p3196_p6 = por %p3195_p5, %p3194_p4 }
  0x10   :  { %p3197_p7 = pnand %p3196_p6, %p3190_p3 }
  0x12   :  { %3200 = shalt.err (!%p3197_p7)
}
  0x13   :  { %s3344_s19 = smov 256   ;;  %s3345_s20 = smov 16  }
  0x14   :  { %44 = dma.hbm_to_vmem [thread:$0]  %s4004_s2, 1024, %s39_s10, [#allocation10], %s3344_s19, %s3344_s19, %s3345_s20  }
  0x15   :  { %s3346_s23 = smov [#allocation12]   ;;  %s3347_s25 = smov [#allocation6]  }
  0x16   :  { %s64_s24 = sshll.u32 %s3346_s23, 4  ;;  %s26_s26 = sshll.u32 %s3347_s25, 4  ;;  %s65_s24 = int_to_ptr.vmem [resolvable:$true] %s64_s24  ;;  %s27_s26 = int_to_ptr.vmem [resolvable:$true] %s26_s26 }
  0x17   :  { %s3201_s29 = scalar_lea.hbm %s4007_s5, 512 }
  0x18   :  { %p3202_p8 = scmp.ne.s32.totalorder %s4007_s5, %s3201_s29  ;;  %p3205_p9 = scmp.lt.u32.totalorder %s3201_s29, %s4007_s5 }
  0x1a   :  { %p3207_p10 = pnand %p3205_p9, %p3202_p8 }
  0x1c   :  { %3210 = shalt.err (!%p3207_p10)
}
  0x1d   :  { %s3211_s2 = scalar_lea.vmem %s65_s24, 512  ;;  %p3216_p12 = scmp.lt.s32.totalorder %s65_s24, %s65_s24 }
  0x1e   :  { %p3212_p11 = scmp.ne.s32.totalorder %s65_s24, %s3211_s2  ;;  %p3217_p13 = scmp.lt.s32.totalorder %s3211_s2, %s3211_s2 }
  0x20   :  { %p3218_p0 = por %p3217_p13, %p3216_p12 }
  0x22   :  { %p3219_p1 = pnand %p3218_p0, %p3212_p11 }
  0x24   :  { %3222 = shalt.err (!%p3219_p1)
}
  0x25   :  { %s3348_s10 = smov 128   ;;  %s3349_s14 = smov 8  }
  0x26   :  { %70 = dma.hbm_to_vmem [thread:$0]  %s4007_s5, 512, %s65_s24, [#allocation13], %s3348_s10, %s3348_s10, %s3349_s14  }
  0x27   :  { %s3223_s19 = scalar_lea.hbm %s4003_s1, 256 }
  0x28   :  { %p3224_p2 = scmp.ne.s32.totalorder %s4003_s1, %s3223_s19  ;;  %p3227_p3 = scmp.lt.u32.totalorder %s3223_s19, %s4003_s1 }
  0x2a   :  { %p3229_p4 = pnand %p3227_p3, %p3224_p2 }
  0x2c   :  { %3232 = shalt.err (!%p3229_p4)
}
  0x2d   :  { %s3233_s25 = scalar_lea.vmem %s27_s26, 256  ;;  %p3238_p6 = scmp.lt.s32.totalorder %s27_s26, %s27_s26 }
  0x2e   :  { %p3234_p5 = scmp.ne.s32.totalorder %s27_s26, %s3233_s25  ;;  %p3239_p7 = scmp.lt.s32.totalorder %s3233_s25, %s3233_s25 }
  0x30   :  { %p3240_p8 = por %p3239_p7, %p3238_p6 }
  0x32   :  { %p3241_p9 = pnand %p3240_p8, %p3234_p5 }
  0x34   :  { %3244 = shalt.err (!%p3241_p9)
}
  0x35   :  { %s3350_s5 = smov 32   ;;  %s3351_s24 = smov 2  }
  0x36   :  { %32 = dma.hbm_to_vmem [thread:$0]  %s4003_s1, 256, %s27_s26, [#allocation7], %s3350_s5, %s3350_s5, %s3351_s24  }
  0x37   :  { %s3352_s29 = smov [#allocation11]   ;;  %s3353_s11 = smov [#allocation14]  }
  0x38   :  { %s52_s30 = sshll.u32 %s3352_s29, 4  ;;  %s76_s12 = sshll.u32 %s3353_s11, 4  ;;  %s53_s30 = int_to_ptr.vmem [resolvable:$true] %s52_s30  ;;  %s77_s12 = int_to_ptr.vmem [resolvable:$true] %s76_s12 }
  0x39   :  { %s3245_s15 = scalar_lea.hbm %s4006_s4, 512 }
  0x3a   :  { %p3246_p10 = scmp.ne.s32.totalorder %s4006_s4, %s3245_s15  ;;  %p3249_p11 = scmp.lt.u32.totalorder %s3245_s15, %s4006_s4 }
  0x3c   :  { %p3251_p12 = pnand %p3249_p11, %p3246_p10 }
  0x3e   :  { %3254 = shalt.err (!%p3251_p12)
}
  0x3f   :  { %s3255_s1 = scalar_lea.vmem %s53_s30, 512  ;;  %p3260_p0 = scmp.lt.s32.totalorder %s53_s30, %s53_s30 }
  0x40   :  { %p3256_p13 = scmp.ne.s32.totalorder %s53_s30, %s3255_s1  ;;  %p3261_p1 = scmp.lt.s32.totalorder %s3255_s1, %s3255_s1 }
  0x42   :  { %p3262_p2 = por %p3261_p1, %p3260_p0 }
  0x44   :  { %p3263_p3 = pnand %p3262_p2, %p3256_p13 }
  0x46   :  { %3266 = shalt.err (!%p3263_p3)
}
  0x47   :  { %58 = dma.hbm_to_vmem [thread:$0]  %s4006_s4, 512, %s53_s30, [#allocation10], %s3348_s10, %s3348_s10, %s3349_s14  }
  0x48   :  { %s3267_s23 = scalar_lea.hbm %s4008_s6, 512 }
  0x49   :  { %p3268_p4 = scmp.ne.s32.totalorder %s4008_s6, %s3267_s23  ;;  %p3271_p5 = scmp.lt.u32.totalorder %s3267_s23, %s4008_s6 }
  0x4b   :  { %p3273_p6 = pnand %p3271_p5, %p3268_p4 }
  0x4d   :  { %3276 = shalt.err (!%p3273_p6)
}
  0x4e   :  { %s3277_s11 = scalar_lea.vmem %s77_s12, 512  ;;  %p3282_p8 = scmp.lt.s32.totalorder %s77_s12, %s77_s12 }
  0x4f   :  { %p3278_p7 = scmp.ne.s32.totalorder %s77_s12, %s3277_s11  ;;  %p3283_p9 = scmp.lt.s32.totalorder %s3277_s11, %s3277_s11 }
  0x51   :  { %p3284_p10 = por %p3283_p9, %p3282_p8 }
  0x53   :  { %p3285_p11 = pnand %p3284_p10, %p3278_p7 }
  0x55   :  { %3288 = shalt.err (!%p3285_p11)
}
  0x56   :  { %82 = dma.hbm_to_vmem [thread:$0]  %s4008_s6, 512, %s77_s12, [#allocation13], %s3348_s10, %s3348_s10, %s3349_s14  }
  0x57   :  { %s3354_s13 = smov [#allocation15]   ;;  %s3289_s17 = scalar_lea.hbm %s4009_s7, 512 }
  0x58   :  { %s88_s2 = sshll.u32 %s3354_s13, 4  ;;  %p3290_p12 = scmp.ne.s32.totalorder %s4009_s7, %s3289_s17  ;;  %s89_s2 = int_to_ptr.vmem [resolvable:$true] %s88_s2 }
  0x59   :  { %p3293_p13 = scmp.lt.u32.totalorder %s3289_s17, %s4009_s7 }
  0x5b   :  { %p3295_p0 = pnand %p3293_p13, %p3290_p12 }
  0x5d   :  { %3298 = shalt.err (!%p3295_p0)
}
  0x5e   :  { %s3299_s20 = scalar_lea.vmem %s89_s2, 512  ;;  %p3304_p2 = scmp.lt.s32.totalorder %s89_s2, %s89_s2 }
  0x5f   :  { %p3300_p1 = scmp.ne.s32.totalorder %s89_s2, %s3299_s20  ;;  %p3305_p3 = scmp.lt.s32.totalorder %s3299_s20, %s3299_s20 }
  0x61   :  { %p3306_p4 = por %p3305_p3, %p3304_p2 }
  0x63   :  { %p3307_p5 = pnand %p3306_p4, %p3300_p1 }
  0x65   :  { %3310 = shalt.err (!%p3307_p5)
}
  0x66   :  { %94 = dma.hbm_to_vmem [thread:$0]  %s4009_s7, 512, %s89_s2, [#allocation16], %s3348_s10, %s3348_s10, %s3349_s14  }
  0x67   :  { %3333 = dma.done.wait [#allocation7], 256  }
  0x68   :  { %3334 = vsyncadd [#allocation7], 4294967040 }
  0x69   :  { %3335 = dma.done.wait [#allocation10], 1536  }
  0x6a   :  { %3336 = vsyncadd [#allocation10], 4294965760 }
  0x6b   :  { %3337 = dma.done.wait [#allocation13], 1024  }
  0x6c   :  { %3338 = vsyncadd [#allocation13], 4294966272 }
  0x6d   :  { %3339 = dma.done.wait [#allocation16], 512  }
  0x6e   :  { %3340 = vsyncadd [#allocation16], 4294966784  ;;  %v3355_v0 = vmov 0.0   ;;  %v142_v1 = vlaneseq  ;;  %v3356_v2 = vmov 1983009808   ;;  %v3357_v4 = vmov 0.0|0.0  }
  0x6f   :  { %263 = vmatprep.mubr.f32.mxu0 %v3355_v0  ;;  %v163_v3 = vunpack.c.l.s4 %v3356_v2  ;;  %2908 = vmatprep.subr.bf16.mxu1 %v3357_v4  ;;  %vm3358_vm0 = vmmov 0   ;;  %v133_v7 = vld [vmem:[#allocation9 + $0x8] sm:$0xff]  ;;  %v135_v8 = vld [vmem:[#allocation9 + $0x18] sm:$0xff]  ;;  %v132_v9 = vld [vmem:[#allocation9] sm:$0xff]  ;;  %vm194_vm1 = vcmask 261120   ;;  %v3359_v36 = vmov 0  }
  0x70   :  { %2710 = vmatprep.mubr.msk.f32.mxu1 %vm3358_vm0, %v3355_v0  ;;  %v3503_v5 = vshrl.u32 %v142_v1, 7  ;;  %v2900_v10 = vpack.c.bf16 %v135_v8, %v133_v7  ;;  %v134_v11 = vld [vmem:[#allocation9 + $0x10] sm:$0xff]  ;;  %v137_v12 = vld [vmem:[#allocation9 + $0x28] sm:$0xff]  ;;  %v139_v13 = vld [vmem:[#allocation9 + $0x38] sm:$0xff]  ;;  %3041 = vset.pattern.permute.xlu1 %v3359_v36  ;;  %vm522_vm4 = vcmask 254976  }
  0x71   :  { %v164_v6 = vunpack.c.0.s8 %v163_v3  ;;  %v2902_v14 = vpack.c.bf16 %v134_v11, %v132_v9  ;;  %v2904_v15 = vpack.c.bf16 %v139_v13, %v137_v12  ;;  %v136_v16 = vld [vmem:[#allocation9 + $0x20] sm:$0xff]  ;;  %v138_v17 = vld [vmem:[#allocation9 + $0x30] sm:$0xff]  ;;  %v125_v27 = vld [vmem:[#allocation11 + $0x8] sm:$0xff]  ;;  %3042 = vset.pattern.permute.xlu0 %v3359_v36 }
  0x72   :  { %v115_v18 = vld [vmem:[#allocation6] sm:$0x3]  ;;  %2901 = vmatprep.subr.bf16.mxu0 %v2900_v10  ;;  %v116_v20 = vld [vmem:[#allocation6 + $0x2] sm:$0x3]  ;;  %v117_v21 = vld [vmem:[#allocation6 + $0x4] sm:$0x3]  ;;  %v2906_v23 = vpack.c.bf16 %v138_v17, %v136_v16 }
  0x73   :  { %v3506_v19 = vsub.s32 %v164_v6, %v3503_v5  ;;  %v118_v22 = vld [vmem:[#allocation6 + $0x6] sm:$0x3]  ;;  %2903 = vmatpush1.bf16.msra.mxu0 %v2902_v14  ;;  %v160_v24 = vcombine.low %v115_v18, %v116_v20  ;;  %v124_v26 = vld [vmem:[#allocation11] sm:$0xff]  ;;  %v127_v30 = vld [vmem:[#allocation11 + $0x18] sm:$0xff]  ;;  %v144_v38 = vsub.s32 0, %v3503_v5  ;;  %v148_v40 = vsub.s32 1, %v3503_v5 }
  0x74   :  { %v161_v25 = vcombine.low %v117_v21, %v118_v22  ;;  %v126_v28 = vld [vmem:[#allocation11 + $0x10] sm:$0xff]  ;;  %2905 = vmatprep.subr.bf16.mxu0 %v2904_v15  ;;  %v3508_v29 = vpack.c.bf16 %v125_v27, %v124_v26  ;;  %v3535_v35 = vld [vmem:[%s4002_s0] sm:$0x3]  ;;  %s3360_s0 = smov 64   ;;  %v120_v14 = vld [vmem:[#allocation6 + $0xa] sm:$0x3] }
  0x75   :  { %v168_v31 = vrot.slane %v160_v24, %v3506_v19  ;;  %v3513_v33 = vpack.c.bf16 %v127_v30, %v126_v28  ;;  %vm511_vm2 = vcmp.gt.s32.totalorder %v3535_v35, 0  ;;  %v140_v39 = vld [vmem:[%s4005_s3] sm:$0x3]  ;;  %v121_v15 = vld [vmem:[#allocation6 + $0xc] sm:$0x3]  ;;  %vm624_vm5 = vcmp.gt.s32.totalorder %v3535_v35, 1 }
  0x76   :  { %v175_v32 = vrot.slane %v161_v25, %v3506_v19  ;;  %2910 = vmatpush3.bf16.msra.mxu1 %v3508_v29  ;;  %v512_v37 = vsel %vm511_vm2, 1, %v3359_v36  ;;  %v3546_v41 = vrot.slane %v140_v39, %v144_v38  ;;  %v3548_v42 = vrot.slane %v140_v39, %v148_v40  ;;  %v119_v13 = vld [vmem:[#allocation6 + $0x8] sm:$0x3]  ;;  %v122_v16 = vld [vmem:[#allocation6 + $0xe] sm:$0x3] }
  0x77   :  { %2907 = vmatpush1.bf16.msra.mxu0 %v2906_v23  ;;  %2911 = vmatprep.subr.bf16.mxu1 %v3357_v4  ;;  %v177_v17 = vcombine.low %v119_v13, %v120_v14  ;;  %v178_v18 = vcombine.low %v121_v15, %v122_v16  ;;  %vm741_vm7 = vcmp.gt.s32.totalorder %v3535_v35, 2  ;;  %vm858_vm9 = vcmp.gt.s32.totalorder %v3535_v35, 3 }
  0x78   :  { %v176_v34 = vcombine.low %v168_v31, %v175_v32  ;;  %2914 = vmatprep.subr.bf16.mxu0 %v3357_v4  ;;  %514 = vperm.xlu1 %3041, %v512_v37   ;;  %v742_v16 = vsel %vm741_vm7, 1, %v3359_v36  ;;  %vm975_vm11 = vcmp.gt.s32.totalorder %v3535_v35, 4  ;;  %vm1092_vm13 = vcmp.gt.s32.totalorder %v3535_v35, 5 }
  0x79   :  { %v185_v20 = vrot.slane %v177_v17, %v3506_v19  ;;  %v192_v21 = vrot.slane %v178_v18, %v3506_v19  ;;  %vm1209_vm15 = vcmp.gt.s32.totalorder %v3535_v35, 6  ;;  %vm1326_vm2 = vcmp.gt.s32.totalorder %v3535_v35, 7 }
  0x7a   :  { %2569 = vmatmul.mubr.msk.f32.vlgmr.msra.gmra.mrb[0].mxu0 %vm194_vm1, %v176_v34  ;;  %2913 = vmatpush3.bf16.msra.mxu1 %v3513_v33 }
  0x7b   :  { %2916 = vmatpush3.bf16.msra.mxu0 %v3508_v29  ;;  %269 = vmatprep.mubr.f32.mxu0 %v3355_v0  ;;  %v193_v22 = vcombine.low %v185_v20, %v192_v21 }
  0x7c   :  { %2917 = vmatprep.subr.bf16.mxu0 %v3357_v4  ;;  %2920 = vmatprep.subr.bf16.mxu1 %v3357_v4 }
  0x7d   :  { %2711 = vmatmul.mubr.f32.vlgmr.msra.gmra.mrb[0].mxu1 %v3355_v0 }
  0x7e   :  { %2922 = vmatpush3.bf16.msra.mxu1 %v3508_v29  ;;  %2732 = vmatprep.mubr.msk.f32.mxu1 %vm3358_vm0, %v3355_v0 }
  0x7f   :  { %2919 = vmatpush3.bf16.msra.mxu0 %v3513_v33  ;;  %2923 = vmatprep.subr.bf16.mxu1 %v3357_v4 }
  0x80   :  { %2926 = vmatprep.subr.bf16.mxu0 %v3357_v4  ;;  %2570 = vmatmul.mubr.msk.f32.gmra.mrb[2].mxu0 %vm194_vm1, %v193_v22 }
  0x81   :  { %2721 = vmatprep.mubr.msk.f32.mxu0 %vm3358_vm0, %v3355_v0 }
  0x82   :  { %2925 = vmatpush3.bf16.msra.mxu1 %v3513_v33 }
  0x83   :  { %2932 = vmatprep.subr.bf16.mxu1 %v3357_v4 }
  0xf7   :  { %v3569_v24 = vpop.permute.xlu1 %514 }
  0xf8   :  { %vm516_vm3 = vcmp.eq.s32.totalorder %v3569_v24, 1 }
 0x14d   :  { %v265_v43 = vpop.f32.mrb[0].mxu0 }
 0x14e   :  { %v266_v44 = vadd.f32 %v265_v43, %v3546_v41  ;;  %v267_v45 = vpop.f32.mrb[1].mxu0 }
 0x14f   :  { %v268_v46 = vadd.f32 %v267_v45, %v3548_v42 }
 0x150   :  { %v482_v47 = vpop.f32.mrb[0].mxu1 }
 0x151   :  { %v280_v48 = vcombine.low %v266_v44, %v268_v46  ;;  %v281_v49 = vcombine.high %v266_v44, %v268_v46  ;;  %v2712_v50 = vpop.f32.mrb[1].mxu1 }
 0x153   :  { %v288_v51 = vrot.slane %v280_v48, %v3506_v19  ;;  %v295_v52 = vrot.slane %v281_v49, %v3506_v19  ;;  %2571 = vst.sshfl [vmem:[#allocation2] sm:$0x3 pattern:$0x76325410] %v280_v48  ;;  %v271_v28 = vpop.f32.mrb[2].mxu0 }
 0x154   :  { %2572 = vst.sshfl [vmem:[#allocation2 + $0x4] sm:$0x3 pattern:$0x76325410] %v281_v49  ;;  %v272_v30 = vadd.f32 %v271_v28, %v3546_v41  ;;  %v273_v31 = vpop.f32.mrb[3].mxu0 }
 0x155   :  { %v296_v53 = vcombine.high %v288_v51, %v288_v51  ;;  %v297_v54 = vcombine.high %v295_v52, %v295_v52  ;;  %v338_v55 = vrot.slane %v288_v51, %v3506_v19  ;;  %v354_v56 = vrot.slane %v295_v52, %v3506_v19 }
 0x156   :  { %v274_v32 = vadd.f32 %v273_v31, %v3548_v42 }
 0x157   :  { %325 = vst [vmem:[#allocation2 + $0x2] sm:$0x3] %v296_v53  ;;  %327 = vst [vmem:[#allocation2 + $0x6] sm:$0x3] %v297_v54  ;;  %v339_v57 = vcombine.high %v338_v55, %v338_v55  ;;  %v346_v58 = vrot.slane %v296_v53, %v3506_v19  ;;  %v355_v59 = vcombine.high %v354_v56, %v354_v56  ;;  %v625_v56 = vsel %vm624_vm5, 1, %v3359_v36 }
 0x158   :  { %v362_v60 = vrot.slane %v297_v54, %v3506_v19  ;;  %v298_v34 = vcombine.low %v272_v30, %v274_v32  ;;  %v299_v37 = vcombine.high %v272_v30, %v274_v32 }
 0x159   :  { %v347_v61 = vcombine.high %v346_v58, %v346_v58  ;;  %404 = vst [vmem:[#allocation3] sm:$0x3] %v339_v57  ;;  %406 = vst [vmem:[#allocation3 + $0x4] sm:$0x3] %v355_v59 }
 0x15a   :  { %v363_v62 = vcombine.high %v362_v60, %v362_v60  ;;  %v412_v63 = vld [vmem:[#allocation2] sm:$0x3]  ;;  %v306_v38 = vrot.slane %v298_v34, %v3506_v19  ;;  %v313_v39 = vrot.slane %v299_v37, %v3506_v19  ;;  %2573 = vst.sshfl [vmem:[#allocation2 + $0x8] sm:$0x3 pattern:$0x76325410] %v298_v34 }
 0x15b   :  { %405 = vst [vmem:[#allocation3 + $0x2] sm:$0x3] %v347_v61  ;;  %v486_v1 = vadd.f32 %v482_v47, %v412_v63  ;;  %2574 = vst.sshfl [vmem:[#allocation2 + $0xc] sm:$0x3 pattern:$0x76325410] %v299_v37 }
 0x15c   :  { %407 = vst [vmem:[#allocation3 + $0x6] sm:$0x3] %v363_v62  ;;  %v314_v40 = vcombine.high %v306_v38, %v306_v38  ;;  %v315_v43 = vcombine.high %v313_v39, %v313_v39  ;;  %v370_v44 = vrot.slane %v306_v38, %v3506_v19  ;;  %v386_v45 = vrot.slane %v313_v39, %v3506_v19 }
 0x15d   :  { %3043 = vtanh.f32 %v486_v1  ;;  %v2575_v3 = vmul.f32 -1.442695, %v486_v1 }
 0x15e   :  { %329 = vst [vmem:[#allocation2 + $0xa] sm:$0x3] %v314_v40  ;;  %331 = vst [vmem:[#allocation2 + $0xe] sm:$0x3] %v315_v43  ;;  %v371_v41 = vcombine.high %v370_v44, %v370_v44  ;;  %v378_v46 = vrot.slane %v314_v40, %v3506_v19  ;;  %v387_v42 = vcombine.high %v386_v45, %v386_v45  ;;  %v526_v51 = vld [vmem:[#allocation2 + $0x2] sm:$0x3] }
 0x15f   :  { %3045 = vpow2.f32 %v2575_v3  ;;  %v394_v47 = vrot.slane %v315_v43, %v3506_v19  ;;  %v757_v39 = vld [vmem:[#allocation2 + $0x6] sm:$0x3] }
 0x160   :  { %v379_v48 = vcombine.high %v378_v46, %v378_v46  ;;  %408 = vst [vmem:[#allocation3 + $0x8] sm:$0x3] %v371_v41  ;;  %410 = vst [vmem:[#allocation3 + $0xc] sm:$0x3] %v387_v42  ;;  %v859_v41 = vsel %vm858_vm9, 1, %v3359_v36 }
 0x161   :  { %v395_v49 = vcombine.high %v394_v47, %v394_v47 }
 0x162   :  { %409 = vst [vmem:[#allocation3 + $0xa] sm:$0x3] %v379_v48 }
 0x163   :  { %411 = vst [vmem:[#allocation3 + $0xe] sm:$0x3] %v395_v49 }
 0x167   :  { %v3044_v2 = vpop.eup %3043 }
 0x168   :  { %496 = vrot.lane.b32.xlu0 %v3044_v2, %s3360_s0 }
 0x169   :  { %v3046_v5 = vpop.eup %3045 }
 0x16a   :  { %v490_v6 = vadd.f32 1.0, %v3046_v5 }
 0x16c   :  { %3047 = vrcp.f32 %v490_v6 }
 0x176   :  { %v3048_v7 = vpop.eup %3047 }
 0x177   :  { %v494_v10 = vmul.f32 0.0, %v3048_v7 }
 0x1da   :  { %v497_v8 = vpop.permute.xlu0 %496 }
 0x1db   :  { %v499_v9 = vmul.f32 %v3048_v7, %v497_v8 }
 0x1dd   :  { %501 = vrot.lane.b32.xlu0 %v499_v9, %s3350_s5 }
 0x24f   :  { %v502_v11 = vpop.permute.xlu0 %501 }
 0x250   :  { %v3560_v12 = vadd.f32 %v502_v11, %v494_v10  ;;  %v640_v11 = vld [vmem:[#allocation2 + $0x4] sm:$0x3] }
 0x252   :  { %3049 = vtanh.f32 %v3560_v12  ;;  %v524_v63 = vsel %vm516_vm3, %v3560_v12, 0.0 }
 0x25c   :  { %v3050_v23 = vpop.eup %3049 }
 0x25d   :  { %507 = vrot.lane.b32.xlu1 %v3050_v23, %s3360_s0 }
 0x2cf   :  { %v508_v25 = vpop.permute.xlu1 %507 }
 0x2d0   :  { %v510_v26 = vmul.f32 %v3048_v7, %v508_v25 }
 0x2d2   :  { %v3574_v27 = vsel %vm516_vm3, %v510_v26, 0.0 }
 0x2d3   :  { %519 = vrot.lane.b32.xlu0 %v3574_v27, %s3350_s5 }
 0x345   :  { %v520_v50 = vpop.permute.xlu0 %519 }
 0x346   :  { %523 = vst.msk [vmem:[#allocation4] sm:$0x3] %vm522_vm4, %v520_v50  ;;  %2722 = vmatmul.mubr.msk.f32.vlgmr.msra.gmra.mrb[4].mxu0 %vm194_vm1, %v520_v50 }
 0x347   :  { %2928 = vmatpush3.bf16.msra.mxu0 %v3508_v29  ;;  %2743 = vmatprep.mubr.msk.f32.mxu0 %vm3358_vm0, %v3355_v0 }
 0x348   :  { %2929 = vmatprep.subr.bf16.mxu0 %v3357_v4 }
 0x34b   :  { %2931 = vmatpush3.bf16.msra.mxu0 %v3513_v33 }
 0x34c   :  { %2938 = vmatprep.subr.bf16.mxu0 %v3357_v4 }
 0x419   :  { %v595_v52 = vpop.f32.mrb[4].mxu0 }
 0x41a   :  { %v599_v53 = vadd.f32 %v595_v52, %v526_v51  ;;  %v2723_v54 = vpop.f32.mrb[5].mxu0 }
 0x41c   :  { %3051 = vtanh.f32 %v599_v53  ;;  %v2577_v57 = vmul.f32 -1.442695, %v599_v53 }
 0x41e   :  { %3053 = vpow2.f32 %v2577_v57 }
 0x426   :  { %v3052_v55 = vpop.eup %3051 }
 0x427   :  { %609 = vrot.lane.b32.xlu1 %v3052_v55, %s3360_s0 }
 0x428   :  { %v3054_v58 = vpop.eup %3053 }
 0x429   :  { %v603_v59 = vadd.f32 1.0, %v3054_v58 }
 0x42b   :  { %627 = vperm.xlu1 %3041, %v625_v56   ;;  %3055 = vrcp.f32 %v603_v59 }
 0x435   :  { %v3056_v60 = vpop.eup %3055 }
 0x436   :  { %v607_v1 = vmul.f32 %v3056_v60, %v524_v63 }
 0x499   :  { %v610_v61 = vpop.permute.xlu1 %609 }
 0x49a   :  { %v612_v62 = vmul.f32 %v3056_v60, %v610_v61  ;;  %v874_v61 = vld [vmem:[#allocation2 + $0x8] sm:$0x3] }
 0x49c   :  { %614 = vrot.lane.b32.xlu0 %v612_v62, %s3350_s5 }
 0x4aa   :  { %v3602_v6 = vpop.permute.xlu1 %627 }
 0x4ab   :  { %vm629_vm6 = vcmp.eq.s32.totalorder %v3602_v6, 1 }
 0x50e   :  { %v615_v2 = vpop.permute.xlu0 %614 }
 0x50f   :  { %v617_v3 = vadd.f32 %v615_v2, %v607_v1 }
 0x511   :  { %3057 = vtanh.f32 %v617_v3  ;;  %v638_v25 = vsel %vm629_vm6, %v617_v3, %v524_v63  ;;  %v976_v3 = vsel %vm975_vm11, 1, %v3359_v36 }
 0x51b   :  { %v3058_v5 = vpop.eup %3057 }
 0x51c   :  { %620 = vrot.lane.b32.xlu0 %v3058_v5, %s3360_s0 }
 0x58e   :  { %v621_v7 = vpop.permute.xlu0 %620 }
 0x58f   :  { %v3604_v8 = vmul.f32 %v3056_v60, %v621_v7 }
 0x591   :  { %v637_v9 = vsel %vm629_vm6, %v3604_v8, %v3574_v27 }
 0x592   :  { %642 = vrot.lane.b32.xlu1 %v637_v9, %s3350_s5 }
 0x604   :  { %v643_v10 = vpop.permute.xlu1 %642 }
 0x605   :  { %2733 = vmatmul.mubr.msk.f32.vlgmr.msra.gmra.mrb[2].mxu1 %vm194_vm1, %v643_v10 }
 0x606   :  { %2934 = vmatpush3.bf16.msra.mxu1 %v3508_v29  ;;  %2754 = vmatprep.mubr.msk.f32.mxu1 %vm3358_vm0, %v3355_v0 }
 0x607   :  { %2935 = vmatprep.subr.bf16.mxu1 %v3357_v4 }
 0x60a   :  { %2937 = vmatpush3.bf16.msra.mxu1 %v3513_v33 }
 0x60b   :  { %2944 = vmatprep.subr.bf16.mxu1 %v3357_v4 }
 0x6d8   :  { %v712_v12 = vpop.f32.mrb[2].mxu1 }
 0x6d9   :  { %v716_v13 = vadd.f32 %v712_v12, %v640_v11  ;;  %v2734_v14 = vpop.f32.mrb[3].mxu1 }
 0x6db   :  { %3059 = vtanh.f32 %v716_v13  ;;  %v2579_v17 = vmul.f32 -1.442695, %v716_v13 }
 0x6dd   :  { %3061 = vpow2.f32 %v2579_v17 }
 0x6e5   :  { %v3060_v15 = vpop.eup %3059 }
 0x6e6   :  { %726 = vrot.lane.b32.xlu0 %v3060_v15, %s3360_s0 }
 0x6e7   :  { %v3062_v18 = vpop.eup %3061 }
 0x6e8   :  { %v720_v20 = vadd.f32 1.0, %v3062_v18 }
 0x6ea   :  { %744 = vperm.xlu0 %3042, %v742_v16   ;;  %3063 = vrcp.f32 %v720_v20 }
 0x6f4   :  { %v3064_v21 = vpop.eup %3063 }
 0x6f5   :  { %v724_v26 = vmul.f32 %v3064_v21, %v638_v25 }
 0x758   :  { %v727_v22 = vpop.permute.xlu0 %726 }
 0x759   :  { %v729_v23 = vmul.f32 %v3064_v21, %v727_v22 }
 0x75b   :  { %731 = vrot.lane.b32.xlu1 %v729_v23, %s3350_s5 }
 0x769   :  { %v3626_v31 = vpop.permute.xlu0 %744 }
 0x76a   :  { %vm746_vm8 = vcmp.eq.s32.totalorder %v3626_v31, 1  ;;  %v2236_v31 = vld [vmem:[#allocation15 + $0x10] sm:$0xff] }
 0x7cd   :  { %v732_v27 = vpop.permute.xlu1 %731 }
 0x7ce   :  { %v734_v28 = vadd.f32 %v732_v27, %v724_v26 }
 0x7d0   :  { %3065 = vtanh.f32 %v734_v28  ;;  %v755_v51 = vsel %vm746_vm8, %v734_v28, %v638_v25  ;;  %v991_v25 = vld [vmem:[#allocation2 + $0xa] sm:$0x3] }
 0x7da   :  { %v3066_v30 = vpop.eup %3065 }
 0x7db   :  { %737 = vrot.lane.b32.xlu1 %v3066_v30, %s3360_s0 }
 0x84d   :  { %v738_v32 = vpop.permute.xlu1 %737 }
 0x84e   :  { %v3628_v34 = vmul.f32 %v3064_v21, %v738_v32 }
 0x850   :  { %v754_v37 = vsel %vm746_vm8, %v3628_v34, %v637_v9 }
 0x851   :  { %759 = vrot.lane.b32.xlu1 %v754_v37, %s3350_s5 }
 0x8c3   :  { %v760_v38 = vpop.permute.xlu1 %759 }
 0x8c4   :  { %2744 = vmatmul.mubr.msk.f32.vlgmr.msra.gmra.mrb[6].mxu0 %vm194_vm1, %v760_v38 }
 0x8c5   :  { %2940 = vmatpush3.bf16.msra.mxu0 %v3508_v29  ;;  %2765 = vmatprep.mubr.msk.f32.mxu0 %vm3358_vm0, %v3355_v0 }
 0x8c6   :  { %2941 = vmatprep.subr.bf16.mxu0 %v3357_v4 }
 0x8c9   :  { %2943 = vmatpush3.bf16.msra.mxu0 %v3513_v33 }
 0x8ca   :  { %2950 = vmatprep.subr.bf16.mxu0 %v3357_v4 }
 0x997   :  { %v829_v40 = vpop.f32.mrb[6].mxu0 }
 0x998   :  { %v833_v43 = vadd.f32 %v829_v40, %v757_v39  ;;  %v2745_v44 = vpop.f32.mrb[7].mxu0 }
 0x99a   :  { %3067 = vtanh.f32 %v833_v43  ;;  %v2581_v46 = vmul.f32 -1.442695, %v833_v43 }
 0x99c   :  { %3069 = vpow2.f32 %v2581_v46 }
 0x9a4   :  { %v3068_v45 = vpop.eup %3067 }
 0x9a5   :  { %843 = vrot.lane.b32.xlu0 %v3068_v45, %s3360_s0 }
 0x9a6   :  { %v3070_v42 = vpop.eup %3069 }
 0x9a7   :  { %v837_v47 = vadd.f32 1.0, %v3070_v42 }
 0x9a9   :  { %861 = vperm.xlu0 %3042, %v859_v41   ;;  %3071 = vrcp.f32 %v837_v47 }
 0x9b3   :  { %v3072_v48 = vpop.eup %3071 }
 0x9b4   :  { %v841_v52 = vmul.f32 %v3072_v48, %v755_v51 }
 0xa17   :  { %v844_v49 = vpop.permute.xlu0 %843 }
 0xa18   :  { %v846_v50 = vmul.f32 %v3072_v48, %v844_v49 }
 0xa1a   :  { %848 = vrot.lane.b32.xlu1 %v846_v50, %s3350_s5  ;;  %v128_v50 = vld [vmem:[#allocation12] sm:$0xff] }
 0xa28   :  { %v3649_v56 = vpop.permute.xlu0 %861 }
 0xa29   :  { %vm863_vm10 = vcmp.eq.s32.totalorder %v3649_v56, 1 }
 0xa8c   :  { %v849_v53 = vpop.permute.xlu1 %848 }
 0xa8d   :  { %v851_v54 = vadd.f32 %v849_v53, %v841_v52  ;;  %v130_v53 = vld [vmem:[#allocation12 + $0x10] sm:$0xff] }
 0xa8f   :  { %3073 = vtanh.f32 %v851_v54  ;;  %v872_v13 = vsel %vm863_vm10, %v851_v54, %v755_v51  ;;  %v129_v51 = vld [vmem:[#allocation12 + $0x8] sm:$0xff]  ;;  %v131_v54 = vld [vmem:[#allocation12 + $0x18] sm:$0xff] }
 0xa90   :  { %v3713_v52 = vpack.c.bf16 %v129_v51, %v128_v50 }
 0xa99   :  { %v3074_v55 = vpop.eup %3073 }
 0xa9a   :  { %854 = vrot.lane.b32.xlu1 %v3074_v55, %s3360_s0 }
 0xb0c   :  { %v855_v57 = vpop.permute.xlu1 %854 }
 0xb0d   :  { %v3651_v58 = vmul.f32 %v3072_v48, %v855_v57  ;;  %v3717_v57 = vpack.c.bf16 %v131_v54, %v130_v53  ;;  %v1445_v53 = vld [vmem:[#allocation3 + $0xc] sm:$0x3] }
 0xb0f   :  { %v871_v59 = vsel %vm863_vm10, %v3651_v58, %v754_v37 }
 0xb10   :  { %876 = vrot.lane.b32.xlu0 %v871_v59, %s3350_s5 }
 0xb82   :  { %v877_v60 = vpop.permute.xlu0 %876 }
 0xb83   :  { %2755 = vmatmul.mubr.msk.f32.vlgmr.msra.gmra.mrb[4].mxu1 %vm194_vm1, %v877_v60 }
 0xb84   :  { %2946 = vmatpush3.bf16.msra.mxu1 %v3508_v29  ;;  %2776 = vmatprep.mubr.msk.f32.mxu1 %vm3358_vm0, %v3355_v0 }
 0xb85   :  { %2947 = vmatprep.subr.bf16.mxu1 %v3357_v4 }
 0xb88   :  { %2949 = vmatpush3.bf16.msra.mxu1 %v3513_v33 }
 0xb89   :  { %2956 = vmatprep.subr.bf16.mxu1 %v3357_v4 }
 0xc56   :  { %v946_v62 = vpop.f32.mrb[4].mxu1 }
 0xc57   :  { %v950_v63 = vadd.f32 %v946_v62, %v874_v61  ;;  %v2756_v1 = vpop.f32.mrb[5].mxu1 }
 0xc59   :  { %3075 = vtanh.f32 %v950_v63  ;;  %v2583_v5 = vmul.f32 -1.442695, %v950_v63  ;;  %v1340_v63 = vld [vmem:[#allocation3 + $0xe] sm:$0x3] }
 0xc5b   :  { %3077 = vpow2.f32 %v2583_v5 }
 0xc63   :  { %v3076_v2 = vpop.eup %3075 }
 0xc64   :  { %960 = vrot.lane.b32.xlu1 %v3076_v2, %s3360_s0 }
 0xc65   :  { %v3078_v7 = vpop.eup %3077 }
 0xc66   :  { %v954_v9 = vadd.f32 1.0, %v3078_v7 }
 0xc68   :  { %978 = vperm.xlu1 %3041, %v976_v3   ;;  %3079 = vrcp.f32 %v954_v9 }
 0xc72   :  { %v3080_v10 = vpop.eup %3079 }
 0xc73   :  { %v958_v14 = vmul.f32 %v3080_v10, %v872_v13 }
 0xcd6   :  { %v961_v11 = vpop.permute.xlu1 %960 }
 0xcd7   :  { %v963_v12 = vmul.f32 %v3080_v10, %v961_v11 }
 0xcd9   :  { %965 = vrot.lane.b32.xlu0 %v963_v12, %s3350_s5 }
 0xce7   :  { %v3672_v18 = vpop.permute.xlu1 %978 }
 0xce8   :  { %vm980_vm12 = vcmp.eq.s32.totalorder %v3672_v18, 1 }
 0xd4b   :  { %v966_v15 = vpop.permute.xlu0 %965 }
 0xd4c   :  { %v968_v16 = vadd.f32 %v966_v15, %v958_v14 }
 0xd4e   :  { %3081 = vtanh.f32 %v968_v16  ;;  %v3694_v43 = vsel %vm980_vm12, %v968_v16, %v872_v13 }
 0xd58   :  { %v3082_v17 = vpop.eup %3081 }
 0xd59   :  { %971 = vrot.lane.b32.xlu0 %v3082_v17, %s3360_s0 }
 0xdcb   :  { %v972_v20 = vpop.permute.xlu0 %971 }
 0xdcc   :  { %v3674_v21 = vmul.f32 %v3080_v10, %v972_v20  ;;  %v1210_v20 = vsel %vm1209_vm15, 1, %v3359_v36 }
 0xdce   :  { %v988_v22 = vsel %vm980_vm12, %v3674_v21, %v871_v59  ;;  %v1108_v59 = vld [vmem:[#allocation2 + $0xc] sm:$0x3]  ;;  %v981_v6 = vsel %vm980_vm12, %v3674_v21, 0.0 }
 0xdcf   :  { %993 = vrot.lane.b32.xlu1 %v988_v22, %s3350_s5 }
 0xe41   :  { %v994_v23 = vpop.permute.xlu1 %993 }
 0xe42   :  { %2766 = vmatmul.mubr.msk.f32.vlgmr.msra.gmra.mrb[8].mxu0 %vm194_vm1, %v994_v23 }
 0xe43   :  { %2952 = vmatpush3.bf16.msra.mxu0 %v3508_v29  ;;  %2787 = vmatprep.mubr.msk.f32.mxu0 %vm3358_vm0, %v3355_v0  ;;  %v1093_v29 = vsel %vm1092_vm13, 1, %v3359_v36 }
 0xe44   :  { %2953 = vmatprep.subr.bf16.mxu0 %v3357_v4 }
 0xe47   :  { %2955 = vmatpush3.bf16.msra.mxu0 %v3513_v33 }
 0xe48   :  { %2962 = vmatprep.subr.bf16.mxu0 %v3357_v4 }
 0xf15   :  { %v1063_v26 = vpop.f32.mrb[8].mxu0 }
 0xf16   :  { %v1067_v27 = vadd.f32 %v1063_v26, %v991_v25  ;;  %v2767_v28 = vpop.f32.mrb[9].mxu0  ;;  %v1327_v25 = vsel %vm1326_vm2, 1, %v3359_v36 }
 0xf18   :  { %3083 = vtanh.f32 %v1067_v27  ;;  %v2585_v32 = vmul.f32 -1.442695, %v1067_v27 }
 0xf1a   :  { %3085 = vpow2.f32 %v2585_v32 }
 0xf22   :  { %v3084_v30 = vpop.eup %3083 }
 0xf23   :  { %1077 = vrot.lane.b32.xlu0 %v3084_v30, %s3360_s0 }
 0xf24   :  { %v3086_v37 = vpop.eup %3085 }
 0xf25   :  { %v1071_v38 = vadd.f32 1.0, %v3086_v37 }
 0xf27   :  { %1095 = vperm.xlu0 %3042, %v1093_v29   ;;  %3087 = vrcp.f32 %v1071_v38 }
 0xf31   :  { %v3088_v33 = vpop.eup %3087 }
 0xf32   :  { %v1075_v44 = vmul.f32 %v3088_v33, %v3694_v43 }
 0xf95   :  { %v1078_v39 = vpop.permute.xlu0 %1077 }
 0xf96   :  { %v1080_v40 = vmul.f32 %v3088_v33, %v1078_v39 }
 0xf98   :  { %1082 = vrot.lane.b32.xlu1 %v1080_v40, %s3350_s5 }
 0xfa6   :  { %v3701_v42 = vpop.permute.xlu0 %1095 }
 0xfa7   :  { %vm1097_vm14 = vcmp.eq.s32.totalorder %v3701_v42, 1 }
0x100a   :  { %v1083_v45 = vpop.permute.xlu1 %1082 }
0x100b   :  { %v3697_v41 = vadd.f32 %v1083_v45, %v1075_v44 }
0x100d   :  { %3089 = vtanh.f32 %v3697_v41  ;;  %v3743_v27 = vsel %vm1097_vm14, %v3697_v41, %v3694_v43 }
0x1017   :  { %v3090_v46 = vpop.eup %3089 }
0x1018   :  { %1088 = vrot.lane.b32.xlu1 %v3090_v46, %s3360_s0 }
0x108a   :  { %v1089_v47 = vpop.permute.xlu1 %1088 }
0x108b   :  { %v3703_v48 = vmul.f32 %v3088_v33, %v1089_v47 }
0x108d   :  { %v3709_v49 = vsel %vm1097_vm14, %v3703_v48, %v988_v22 }
0x108e   :  { %1110 = vrot.lane.b32.xlu0 %v3709_v49, %s3350_s5 }
0x1100   :  { %v1111_v55 = vpop.permute.xlu0 %1110 }
0x1101   :  { %2777 = vmatmul.mubr.msk.f32.vlgmr.msra.gmra.mrb[6].mxu1 %vm194_vm1, %v1111_v55 }
0x1102   :  { %2958 = vmatpush3.bf16.msra.mxu1 %v3713_v52  ;;  %2798 = vmatprep.mubr.msk.f32.mxu1 %vm3358_vm0, %v3355_v0 }
0x1103   :  { %2959 = vmatprep.subr.bf16.mxu1 %v3357_v4 }
0x1106   :  { %2961 = vmatpush3.bf16.msra.mxu1 %v3717_v57 }
0x1107   :  { %2968 = vmatprep.subr.bf16.mxu1 %v3357_v4 }
0x1109   :  { %2799 = vmatmul.mubr.f32.vlgmr.msra.gmra.mrb[8].mxu1 %v3355_v0 }
0x110a   :  { %2970 = vmatpush3.bf16.msra.mxu1 %v3713_v52  ;;  %2820 = vmatprep.mubr.msk.f32.mxu1 %vm3358_vm0, %v3355_v0 }
0x110b   :  { %2971 = vmatprep.subr.bf16.mxu1 %v3357_v4 }
0x110e   :  { %2973 = vmatpush3.bf16.msra.mxu1 %v3717_v57 }
0x110f   :  { %2980 = vmatprep.subr.bf16.mxu1 %v3357_v4 }
0x11d4   :  { %v1180_v60 = vpop.f32.mrb[6].mxu1 }
0x11d5   :  { %v1184_v61 = vadd.f32 %v1180_v60, %v1108_v59  ;;  %v2778_v62 = vpop.f32.mrb[7].mxu1 }
0x11d7   :  { %3091 = vtanh.f32 %v1184_v61  ;;  %v2587_v9 = vmul.f32 -1.442695, %v1184_v61 }
0x11dc   :  { %v1407_v1 = vpop.f32.mrb[8].mxu1 }
0x11dd   :  { %v1411_v2 = vadd.f32 %v1407_v1, %v1340_v63  ;;  %v2800_v3 = vpop.f32.mrb[9].mxu1 }
0x11df   :  { %3093 = vtanh.f32 %v1411_v2  ;;  %v2590_v10 = vmul.f32 -1.442695, %v1411_v2 }
0x11e0   :  { %3095 = vpow2.f32 %v2587_v9 }
0x11e1   :  { %v3092_v5 = vpop.eup %3091  ;;  %3097 = vpow2.f32 %v2590_v10 }
0x11e2   :  { %1194 = vrot.lane.b32.xlu1 %v3092_v5, %s3360_s0 }
0x11e9   :  { %v3094_v7 = vpop.eup %3093 }
0x11ea   :  { %1421 = vrot.lane.b32.xlu0 %v3094_v7, %s3360_s0  ;;  %v3096_v11 = vpop.eup %3095 }
0x11eb   :  { %v1188_v12 = vadd.f32 1.0, %v3096_v11  ;;  %v3098_v13 = vpop.eup %3097 }
0x11ec   :  { %v1415_v14 = vadd.f32 1.0, %v3098_v13 }
0x11ed   :  { %3099 = vrcp.f32 %v1188_v12 }
0x11ee   :  { %3101 = vrcp.f32 %v1415_v14 }
0x11f7   :  { %v3100_v15 = vpop.eup %3099 }
0x11f8   :  { %v3102_v22 = vpop.eup %3101  ;;  %v1192_v28 = vmul.f32 %v3100_v15, %v3743_v27 }
0x11f9   :  { %v1419_v35 = vmul.f32 0.0, %v3102_v22 }
0x1254   :  { %v1195_v16 = vpop.permute.xlu1 %1194 }
0x1255   :  { %v1197_v17 = vmul.f32 %v3100_v15, %v1195_v16  ;;  %v1553_v16 = vld [vmem:[#allocation3 + $0xa] sm:$0x3] }
0x1257   :  { %1199 = vrot.lane.b32.xlu1 %v1197_v17, %s3350_s5 }
0x125b   :  { %1212 = vperm.xlu1 %3041, %v1210_v20  }
0x125c   :  { %v1422_v23 = vpop.permute.xlu0 %1421 }
0x125d   :  { %v1424_v26 = vmul.f32 %v3102_v22, %v1422_v23 }
0x125f   :  { %1426 = vrot.lane.b32.xlu0 %v1424_v26, %s3350_s5  ;;  %1329 = vperm.xlu1 %3041, %v1327_v25  }
0x12c9   :  { %v1200_v30 = vpop.permute.xlu1 %1199 }
0x12ca   :  { %v3746_v29 = vadd.f32 %v1200_v30, %v1192_v28 }
0x12cc   :  { %3103 = vtanh.f32 %v3746_v29 }
0x12d1   :  { %v1427_v32 = vpop.permute.xlu0 %1426 }
0x12d2   :  { %v1429_v36 = vadd.f32 %v1427_v32, %v1419_v35 }
0x12d4   :  { %3105 = vtanh.f32 %v1429_v36 }
0x12d6   :  { %v3104_v37 = vpop.eup %3103 }
0x12d7   :  { %1205 = vrot.lane.b32.xlu0 %v3104_v37, %s3360_s0 }
0x12da   :  { %v3751_v33 = vpop.permute.xlu1 %1212 }
0x12db   :  { %vm1214_vm5 = vcmp.eq.s32.totalorder %v3751_v33, 1  ;;  %v2230_v33 = vld [vmem:[#allocation14] sm:$0xff] }
0x12de   :  { %v3106_v38 = vpop.eup %3105  ;;  %v3761_v44 = vpop.permute.xlu1 %1329 }
0x12df   :  { %1432 = vrot.lane.b32.xlu0 %v3106_v38, %s3360_s0  ;;  %vm1331_vm7 = vcmp.eq.s32.totalorder %v3761_v44, 1 }
0x12e0   :  { %v1443_v5 = vsel %vm1331_vm7, %v1429_v36, 0.0 }
0x1349   :  { %v1206_v39 = vpop.permute.xlu0 %1205 }
0x134a   :  { %v3753_v40 = vmul.f32 %v3100_v15, %v1206_v39 }
0x134c   :  { %v1222_v43 = vsel %vm1214_vm5, %v3753_v40, %v3709_v49 }
0x134d   :  { %1227 = vrot.lane.b32.xlu1 %v1222_v43, %s3350_s5 }
0x1351   :  { %v1433_v45 = vpop.permute.xlu0 %1432 }
0x1352   :  { %v1435_v41 = vmul.f32 %v3102_v22, %v1433_v45 }
0x1354   :  { %v1436_v46 = vsel %vm1331_vm7, %v1435_v41, 0.0 }
0x1355   :  { %1438 = vrot.lane.b32.xlu0 %v1436_v46, %s3350_s5 }
0x13bf   :  { %v1228_v47 = vpop.permute.xlu1 %1227 }
0x13c0   :  { %2788 = vmatmul.mubr.msk.f32.vlgmr.msra.gmra.mrb[10].mxu0 %vm194_vm1, %v1228_v47 }
0x13c1   :  { %2964 = vmatpush3.bf16.msra.mxu0 %v3713_v52  ;;  %2809 = vmatprep.mubr.msk.f32.mxu0 %vm3358_vm0, %v3355_v0 }
0x13c2   :  { %2965 = vmatprep.subr.bf16.mxu0 %v3357_v4 }
0x13c5   :  { %2967 = vmatpush3.bf16.msra.mxu0 %v3717_v57 }
0x13c6   :  { %2974 = vmatprep.subr.bf16.mxu0 %v3357_v4 }
0x13c7   :  { %v1439_v49 = vpop.permute.xlu0 %1438 }
0x13c8   :  { %1442 = vst.msk [vmem:[#allocation5 + $0xe] sm:$0x3] %vm522_vm4, %v1439_v49  ;;  %2810 = vmatmul.mubr.msk.f32.vlgmr.msra.gmra.mrb[12].mxu0 %vm194_vm1, %v1439_v49  ;;  %v1664_v49 = vld [vmem:[#allocation3 + $0x8] sm:$0x3] }
0x13c9   :  { %2976 = vmatpush3.bf16.msra.mxu0 %v3713_v52  ;;  %2831 = vmatprep.mubr.msk.f32.mxu0 %vm3358_vm0, %v3355_v0 }
0x13ca   :  { %2977 = vmatprep.subr.bf16.mxu0 %v3357_v4 }
0x13cd   :  { %2979 = vmatpush3.bf16.msra.mxu0 %v3717_v57 }
0x13ce   :  { %2986 = vmatprep.subr.bf16.mxu0 %v3357_v4 }
0x1493   :  { %v3782_v50 = vpop.f32.mrb[10].mxu0 }
0x1494   :  { %v2789_v51 = vpop.f32.mrb[11].mxu0 }
0x149b   :  { %v1514_v54 = vpop.f32.mrb[12].mxu0 }
0x149c   :  { %v1518_v55 = vadd.f32 %v1514_v54, %v1445_v53  ;;  %v2811_v59 = vpop.f32.mrb[13].mxu0 }
0x149e   :  { %3107 = vtanh.f32 %v1518_v55  ;;  %v2592_v61 = vmul.f32 -1.442695, %v1518_v55 }
0x14a0   :  { %3109 = vpow2.f32 %v2592_v61 }
0x14a8   :  { %v3108_v60 = vpop.eup %3107 }
0x14a9   :  { %1528 = vrot.lane.b32.xlu1 %v3108_v60, %s3360_s0 }
0x14aa   :  { %v3110_v62 = vpop.eup %3109 }
0x14ab   :  { %v1522_v63 = vadd.f32 1.0, %v3110_v62 }
0x14ad   :  { %3111 = vrcp.f32 %v1522_v63 }
0x14b7   :  { %v3112_v1 = vpop.eup %3111 }
0x14b8   :  { %v1526_v7 = vmul.f32 %v3112_v1, %v1443_v5 }
0x151b   :  { %v1529_v2 = vpop.permute.xlu1 %1528 }
0x151c   :  { %v1531_v3 = vmul.f32 %v3112_v1, %v1529_v2 }
0x151e   :  { %1533 = vrot.lane.b32.xlu0 %v1531_v3, %s3350_s5 }
0x1590   :  { %v1534_v9 = vpop.permute.xlu0 %1533 }
0x1591   :  { %v1536_v10 = vadd.f32 %v1534_v9, %v1526_v7 }
0x1593   :  { %3113 = vtanh.f32 %v1536_v10  ;;  %v1551_v36 = vsel %vm1214_vm5, %v1536_v10, %v1443_v5 }
0x159d   :  { %v3114_v11 = vpop.eup %3113 }
0x159e   :  { %1539 = vrot.lane.b32.xlu1 %v3114_v11, %s3360_s0 }
0x1610   :  { %v1540_v12 = vpop.permute.xlu1 %1539 }
0x1611   :  { %v3789_v13 = vmul.f32 %v3112_v1, %v1540_v12 }
0x1613   :  { %v1550_v14 = vsel %vm1214_vm5, %v3789_v13, %v1436_v46 }
0x1614   :  { %1555 = vrot.lane.b32.xlu0 %v1550_v14, %s3350_s5 }
0x1686   :  { %v1556_v15 = vpop.permute.xlu0 %1555 }
0x1687   :  { %2821 = vmatmul.mubr.msk.f32.vlgmr.msra.gmra.mrb[10].mxu1 %vm194_vm1, %v1556_v15  ;;  %v1775_v15 = vld [vmem:[#allocation3 + $0x6] sm:$0x3] }
0x1688   :  { %2982 = vmatpush3.bf16.msra.mxu1 %v3713_v52  ;;  %2842 = vmatprep.mubr.msk.f32.mxu1 %vm3358_vm0, %v3355_v0 }
0x1689   :  { %2983 = vmatprep.subr.bf16.mxu1 %v3357_v4 }
0x168c   :  { %2985 = vmatpush3.bf16.msra.mxu1 %v3717_v57 }
0x168d   :  { %2992 = vmatprep.subr.bf16.mxu1 %v3357_v4 }
0x175a   :  { %v1625_v17 = vpop.f32.mrb[10].mxu1 }
0x175b   :  { %v1629_v20 = vadd.f32 %v1625_v17, %v1553_v16  ;;  %v2822_v22 = vpop.f32.mrb[11].mxu1 }
0x175d   :  { %3115 = vtanh.f32 %v1629_v20  ;;  %v2594_v25 = vmul.f32 -1.442695, %v1629_v20 }
0x175f   :  { %3117 = vpow2.f32 %v2594_v25 }
0x1767   :  { %v3116_v23 = vpop.eup %3115 }
0x1768   :  { %1639 = vrot.lane.b32.xlu1 %v3116_v23, %s3360_s0 }
0x1769   :  { %v3118_v26 = vpop.eup %3117 }
0x176a   :  { %v1633_v28 = vadd.f32 1.0, %v3118_v26 }
0x176c   :  { %3119 = vrcp.f32 %v1633_v28 }
0x1776   :  { %v3120_v30 = vpop.eup %3119 }
0x1777   :  { %v1637_v37 = vmul.f32 %v3120_v30, %v1551_v36 }
0x17da   :  { %v1640_v35 = vpop.permute.xlu1 %1639 }
0x17db   :  { %v1642_v32 = vmul.f32 %v3120_v30, %v1640_v35 }
0x17dd   :  { %1644 = vrot.lane.b32.xlu0 %v1642_v32, %s3350_s5 }
0x184f   :  { %v1645_v38 = vpop.permute.xlu0 %1644 }
0x1850   :  { %v1647_v39 = vadd.f32 %v1645_v38, %v1637_v37 }
0x1852   :  { %3121 = vtanh.f32 %v1647_v39  ;;  %v1662_v2 = vsel %vm1097_vm14, %v1647_v39, %v1551_v36 }
0x185c   :  { %v3122_v43 = vpop.eup %3121 }
0x185d   :  { %1650 = vrot.lane.b32.xlu1 %v3122_v43, %s3360_s0 }
0x18cf   :  { %v1651_v45 = vpop.permute.xlu1 %1650 }
0x18d0   :  { %v3807_v41 = vmul.f32 %v3120_v30, %v1651_v45 }
0x18d2   :  { %v1661_v46 = vsel %vm1097_vm14, %v3807_v41, %v1550_v14 }
0x18d3   :  { %1666 = vrot.lane.b32.xlu0 %v1661_v46, %s3350_s5 }
0x1945   :  { %v1667_v47 = vpop.permute.xlu0 %1666 }
0x1946   :  { %2832 = vmatmul.mubr.msk.f32.vlgmr.msra.gmra.mrb[14].mxu0 %vm194_vm1, %v1667_v47 }
0x1947   :  { %2988 = vmatpush3.bf16.msra.mxu0 %v3713_v52  ;;  %2853 = vmatprep.mubr.msk.f32.mxu0 %vm3358_vm0, %v3355_v0 }
0x1948   :  { %2989 = vmatprep.subr.bf16.mxu0 %v3357_v4 }
0x194b   :  { %2991 = vmatpush3.bf16.msra.mxu0 %v3717_v57 }
0x194c   :  { %2998 = vmatprep.subr.bf16.mxu0 %v3357_v4 }
0x1a19   :  { %v1736_v51 = vpop.f32.mrb[14].mxu0 }
0x1a1a   :  { %v1740_v53 = vadd.f32 %v1736_v51, %v1664_v49  ;;  %v2833_v54 = vpop.f32.mrb[15].mxu0  ;;  %v1886_v49 = vld [vmem:[#allocation3 + $0x4] sm:$0x3] }
0x1a1c   :  { %3123 = vtanh.f32 %v1740_v53  ;;  %v2596_v59 = vmul.f32 -1.442695, %v1740_v53 }
0x1a1e   :  { %3125 = vpow2.f32 %v2596_v59 }
0x1a26   :  { %v3124_v55 = vpop.eup %3123 }
0x1a27   :  { %1750 = vrot.lane.b32.xlu1 %v3124_v55, %s3360_s0 }
0x1a28   :  { %v3126_v60 = vpop.eup %3125 }
0x1a29   :  { %v1744_v61 = vadd.f32 1.0, %v3126_v60 }
0x1a2b   :  { %3127 = vrcp.f32 %v1744_v61 }
0x1a35   :  { %v3128_v62 = vpop.eup %3127 }
0x1a36   :  { %v1748_v3 = vmul.f32 %v3128_v62, %v1662_v2 }
0x1a99   :  { %v1751_v63 = vpop.permute.xlu1 %1750 }
0x1a9a   :  { %v1753_v1 = vmul.f32 %v3128_v62, %v1751_v63 }
0x1a9c   :  { %1755 = vrot.lane.b32.xlu0 %v1753_v1, %s3350_s5 }
0x1b0e   :  { %v1756_v5 = vpop.permute.xlu0 %1755 }
0x1b0f   :  { %v1758_v7 = vadd.f32 %v1756_v5, %v1748_v3 }
0x1b11   :  { %3129 = vtanh.f32 %v1758_v7  ;;  %v1773_v32 = vsel %vm980_vm12, %v1758_v7, %v1662_v2 }
0x1b1b   :  { %v3130_v9 = vpop.eup %3129 }
0x1b1c   :  { %1761 = vrot.lane.b32.xlu1 %v3130_v9, %s3360_s0 }
0x1b8e   :  { %v1762_v10 = vpop.permute.xlu1 %1761 }
0x1b8f   :  { %v3825_v11 = vmul.f32 %v3128_v62, %v1762_v10  ;;  %v1997_v10 = vld [vmem:[#allocation3 + $0x2] sm:$0x3] }
0x1b91   :  { %v1772_v12 = vsel %vm980_vm12, %v3825_v11, %v1661_v46 }
0x1b92   :  { %1777 = vrot.lane.b32.xlu0 %v1772_v12, %s3350_s5 }
0x1c04   :  { %v1778_v14 = vpop.permute.xlu0 %1777 }
0x1c05   :  { %2843 = vmatmul.mubr.msk.f32.vlgmr.msra.gmra.mrb[12].mxu1 %vm194_vm1, %v1778_v14 }
0x1c06   :  { %2994 = vmatpush3.bf16.msra.mxu1 %v3713_v52  ;;  %2864 = vmatprep.mubr.msk.f32.mxu1 %vm3358_vm0, %v3355_v0 }
0x1c07   :  { %2995 = vmatprep.subr.bf16.mxu1 %v3357_v4 }
0x1c0a   :  { %2997 = vmatpush3.bf16.msra.mxu1 %v3717_v57 }
0x1cd8   :  { %v1847_v16 = vpop.f32.mrb[12].mxu1 }
0x1cd9   :  { %v1851_v17 = vadd.f32 %v1847_v16, %v1775_v15  ;;  %v2844_v20 = vpop.f32.mrb[13].mxu1 }
0x1cdb   :  { %3131 = vtanh.f32 %v1851_v17  ;;  %v2598_v23 = vmul.f32 -1.442695, %v1851_v17 }
0x1cdd   :  { %3133 = vpow2.f32 %v2598_v23 }
0x1ce5   :  { %v3132_v22 = vpop.eup %3131 }
0x1ce6   :  { %1861 = vrot.lane.b32.xlu1 %v3132_v22, %s3360_s0 }
0x1ce7   :  { %v3134_v25 = vpop.eup %3133 }
0x1ce8   :  { %v1855_v26 = vadd.f32 1.0, %v3134_v25 }
0x1cea   :  { %3135 = vrcp.f32 %v1855_v26 }
0x1cf4   :  { %v3136_v28 = vpop.eup %3135 }
0x1cf5   :  { %v1859_v36 = vmul.f32 %v3136_v28, %v1773_v32 }
0x1d58   :  { %v1862_v30 = vpop.permute.xlu1 %1861 }
0x1d59   :  { %v1864_v35 = vmul.f32 %v3136_v28, %v1862_v30 }
0x1d5b   :  { %1866 = vrot.lane.b32.xlu0 %v1864_v35, %s3350_s5 }
0x1dcd   :  { %v1867_v37 = vpop.permute.xlu0 %1866 }
0x1dce   :  { %v1869_v38 = vadd.f32 %v1867_v37, %v1859_v36  ;;  %v1225_v37 = vld [vmem:[#allocation2 + $0xe] sm:$0x3] }
0x1dd0   :  { %3137 = vtanh.f32 %v1869_v38 }
0x1dda   :  { %v3138_v39 = vpop.eup %3137 }
0x1ddb   :  { %1872 = vrot.lane.b32.xlu1 %v3138_v39, %s3360_s0 }
0x1e4d   :  { %v1873_v43 = vpop.permute.xlu1 %1872 }
0x1e4e   :  { %v3842_v45 = vmul.f32 %v3136_v28, %v1873_v43 }
0x1e50   :  { %v1883_v46 = vsel %vm863_vm10, %v3842_v45, %v1772_v12 }
0x1e51   :  { %1888 = vrot.lane.b32.xlu0 %v1883_v46, %s3350_s5 }
0x1ec3   :  { %v1889_v47 = vpop.permute.xlu0 %1888 }
0x1ec4   :  { %2854 = vmatmul.mubr.msk.f32.vlgmr.msra.gmra.mrb[16].mxu0 %vm194_vm1, %v1889_v47 }
0x1ec5   :  { %3000 = vmatpush3.bf16.msra.mxu0 %v3713_v52  ;;  %2875 = vmatprep.mubr.msk.f32.mxu0 %vm3358_vm0, %v3355_v0 }
0x1ec6   :  { %3001 = vmatprep.subr.bf16.mxu0 %v3357_v4  ;;  %v1884_v4 = vsel %vm863_vm10, %v1869_v38, %v1773_v32  ;;  %v1301_v38 = vadd.f32 %v3782_v50, %v1225_v37 }
0x1ec9   :  { %3003 = vmatpush3.bf16.msra.mxu0 %v3717_v57 }
0x1f97   :  { %v1958_v51 = vpop.f32.mrb[16].mxu0 }
0x1f98   :  { %v1962_v53 = vadd.f32 %v1958_v51, %v1886_v49  ;;  %v2855_v54 = vpop.f32.mrb[17].mxu0  ;;  %v2589_v49 = vmul.f32 -1.442695, %v1301_v38 }
0x1f9a   :  { %3139 = vtanh.f32 %v1962_v53  ;;  %v2600_v59 = vmul.f32 -1.442695, %v1962_v53 }
0x1f9c   :  { %3141 = vpow2.f32 %v2600_v59 }
0x1fa4   :  { %v3140_v55 = vpop.eup %3139 }
0x1fa5   :  { %1972 = vrot.lane.b32.xlu1 %v3140_v55, %s3360_s0 }
0x1fa6   :  { %v3142_v60 = vpop.eup %3141 }
0x1fa7   :  { %v1966_v61 = vadd.f32 1.0, %v3142_v60  ;;  %v1223_v60 = vsel %vm1214_vm5, %v3746_v29, %v3743_v27  ;;  %v630_v27 = vsel %vm629_vm6, %v3604_v8, 0.0  ;;  %v2107_v29 = vld [vmem:[#allocation3] sm:$0x3] }
0x1fa9   :  { %3143 = vrcp.f32 %v1966_v61 }
0x1fb3   :  { %v3144_v52 = vpop.eup %3143 }
0x1fb4   :  { %v1970_v57 = vmul.f32 %v3144_v52, %v1884_v4 }
0x2017   :  { %v1973_v62 = vpop.permute.xlu1 %1972 }
0x2018   :  { %v1975_v0 = vmul.f32 %v3144_v52, %v1973_v62 }
0x201a   :  { %1977 = vrot.lane.b32.xlu0 %v1975_v0, %s3350_s5 }
0x208c   :  { %v1978_v63 = vpop.permute.xlu0 %1977 }
0x208d   :  { %v1980_v1 = vadd.f32 %v1978_v63, %v1970_v57  ;;  %v1654_v57 = vsel %vm1097_vm14, %v3807_v41, 0.0 }
0x208f   :  { %3145 = vtanh.f32 %v1980_v1  ;;  %v3867_v28 = vsel %vm746_vm8, %v1980_v1, %v1884_v4 }
0x2099   :  { %v3146_v2 = vpop.eup %3145 }
0x209a   :  { %1983 = vrot.lane.b32.xlu1 %v3146_v2, %s3360_s0 }
0x210c   :  { %v1984_v3 = vpop.permute.xlu1 %1983 }
0x210d   :  { %v1986_v5 = vmul.f32 %v3144_v52, %v1984_v3 }
0x210f   :  { %v1994_v7 = vsel %vm746_vm8, %v1986_v5, %v1883_v46  ;;  %v1987_v4 = vsel %vm746_vm8, %v1986_v5, 0.0 }
0x2110   :  { %1999 = vrot.lane.b32.xlu0 %v1994_v7, %s3350_s5 }
0x2182   :  { %v2000_v9 = vpop.permute.xlu0 %1999 }
0x2183   :  { %2865 = vmatmul.mubr.msk.f32.vlgmr.msra.gmra.mrb[14].mxu1 %vm194_vm1, %v2000_v9 }
0x2256   :  { %v2069_v12 = vpop.f32.mrb[14].mxu1 }
0x2257   :  { %v2073_v14 = vadd.f32 %v2069_v12, %v1997_v10  ;;  %v2866_v15 = vpop.f32.mrb[15].mxu1 }
0x2259   :  { %3147 = vtanh.f32 %v2073_v14  ;;  %v2602_v17 = vmul.f32 -1.442695, %v2073_v14 }
0x225b   :  { %3149 = vpow2.f32 %v2602_v17 }
0x2263   :  { %v3148_v16 = vpop.eup %3147 }
0x2264   :  { %2083 = vrot.lane.b32.xlu1 %v3148_v16, %s3360_s0 }
0x2265   :  { %v3150_v20 = vpop.eup %3149 }
0x2266   :  { %v2077_v22 = vadd.f32 1.0, %v3150_v20 }
0x2268   :  { %3151 = vrcp.f32 %v2077_v22 }
0x2272   :  { %v3152_v23 = vpop.eup %3151 }
0x2273   :  { %v2081_v30 = vmul.f32 %v3152_v23, %v3867_v28 }
0x22d6   :  { %v2084_v25 = vpop.permute.xlu1 %2083 }
0x22d7   :  { %v2086_v26 = vmul.f32 %v3152_v23, %v2084_v25 }
0x22d9   :  { %2088 = vrot.lane.b32.xlu0 %v2086_v26, %s3350_s5  ;;  %v1876_v26 = vsel %vm863_vm10, %v3842_v45, 0.0  ;;  %v747_v45 = vsel %vm746_vm8, %v3628_v34, 0.0  ;;  %v2237_v34 = vld [vmem:[#allocation15 + $0x18] sm:$0xff] }
0x234b   :  { %v2089_v35 = vpop.permute.xlu0 %2088 }
0x234c   :  { %v2091_v32 = vadd.f32 %v2089_v35, %v2081_v30  ;;  %v1765_v35 = vsel %vm980_vm12, %v3825_v11, 0.0  ;;  %v2234_v11 = vld [vmem:[#allocation15] sm:$0xff] }
0x234e   :  { %3153 = vtanh.f32 %v2091_v32  ;;  %v2106_v17 = vsel %vm629_vm6, %v2091_v32, %v3867_v28  ;;  %v1543_v28 = vsel %vm1214_vm5, %v3789_v13, 0.0  ;;  %v1215_v13 = vsel %vm1214_vm5, %v3753_v40, 0.0  ;;  %v2235_v32 = vld [vmem:[#allocation15 + $0x8] sm:$0xff] }
0x234f   :  { %3155 = vtanh.f32 %v1301_v38  ;;  %v3008_v38 = vpack.c.bf16 %v2237_v34, %v2236_v31  ;;  %v2231_v40 = vld [vmem:[#allocation14 + $0x8] sm:$0xff]  ;;  %v2609_v31 = vld [vmem:[%s4010_s8] ss:$0 sm:$0xff]  ;;  %s3361_s8 = smov [#allocation17]  }
0x2350   :  { %3157 = vpow2.f32 %v2589_v49  ;;  %v1098_v49 = vsel %vm1097_vm14, %v3703_v48, 0.0  ;;  %s2554_s23 = sshll.u32 %s3361_s8, 4  ;;  %s2555_s23 = int_to_ptr.vmem [resolvable:$true] %s2554_s23 }
0x2351   :  { %s3311_s25 = scalar_lea.vmem %s2555_s23, 256  ;;  %p3316_p7 = scmp.lt.s32.totalorder %s2555_s23, %s2555_s23 }
0x2352   :  { %p3312_p6 = scmp.ne.s32.totalorder %s2555_s23, %s3311_s25  ;;  %p3317_p8 = scmp.lt.s32.totalorder %s3311_s25, %s3311_s25 }
0x2354   :  { %p3318_p9 = por %p3317_p8, %p3316_p7 }
0x2356   :  { %p3319_p10 = pnand %p3318_p9, %p3312_p6 }
0x2358   :  { %v3154_v36 = vpop.eup %3153 }
0x2359   :  { %2094 = vrot.lane.b32.xlu1 %v3154_v36, %s3360_s0  ;;  %v3156_v47 = vpop.eup %3155  ;;  %v3004_v36 = vpack.c.bf16 %v2235_v32, %v2234_v11 }
0x235a   :  { %v3158_v51 = vpop.eup %3157 }
0x235b   :  { %v1305_v53 = vadd.f32 1.0, %v3158_v51  ;;  %3005 = vmatprep.subr.bf16.mxu1 %v3004_v36 }
0x235c   :  { %3007 = vmatpush3.bf16.msra.mxu1 %v3004_v36 }
0x235d   :  { %3159 = vrcp.f32 %v1305_v53  ;;  %3009 = vmatprep.subr.bf16.mxu1 %v3008_v38 }
0x2360   :  { %3011 = vmatpush3.bf16.msra.mxu1 %v3008_v38 }
0x2367   :  { %v3877_v50 = vpop.eup %3159 }
0x2368   :  { %v1309_v61 = vmul.f32 %v3877_v50, %v1223_v60 }
0x23cb   :  { %v2095_v39 = vpop.permute.xlu1 %2094 }
0x23cc   :  { %v2097_v43 = vmul.f32 %v3152_v23, %v2095_v39 }
0x23ce   :  { %v2105_v46 = vsel %vm629_vm6, %v2097_v43, %v1994_v7  ;;  %v2098_v30 = vsel %vm629_vm6, %v2097_v43, 0.0  ;;  %v864_v43 = vsel %vm863_vm10, %v3651_v58, 0.0 }
0x23cf   :  { %2109 = vrot.lane.b32.xlu0 %v2105_v46, %s3350_s5  ;;  %v3012_v46 = vpack.c.bf16 %v2231_v40, %v2230_v33 }
0x23d1   :  { %3013 = vmatprep.subr.bf16.mxu1 %v3012_v46 }
0x23d3   :  { %1311 = vrot.lane.b32.xlu0 %v3156_v47, %s3360_s0 }
0x2441   :  { %v2110_v54 = vpop.permute.xlu0 %2109 }
0x2442   :  { %2876 = vmatmul.mubr.msk.f32.vlgmr.msra.gmra.mrb[18].mxu0 %vm194_vm1, %v2110_v54 }
0x2445   :  { %v1312_v55 = vpop.permute.xlu0 %1311 }
0x2446   :  { %v1314_v59 = vmul.f32 %v3877_v50, %v1312_v55 }
0x2448   :  { %1316 = vrot.lane.b32.xlu0 %v1314_v59, %s3350_s5 }
0x24ba   :  { %v1317_v52 = vpop.permute.xlu0 %1316 }
0x24bb   :  { %v1319_v62 = vadd.f32 %v1317_v52, %v1309_v61 }
0x24bd   :  { %3161 = vtanh.f32 %v1319_v62 }
0x24c7   :  { %v3162_v0 = vpop.eup %3161 }
0x24c8   :  { %1322 = vrot.lane.b32.xlu0 %v3162_v0, %s3360_s0  ;;  %v2229_v0 = vld [vmem:[#allocation5 + $0xe] sm:$0x3] }
0x24cc   :  { %1989 = vrot.lane.b32.xlu0 %v1987_v4, %s3350_s5 }
0x24d0   :  { %1656 = vrot.lane.b32.xlu0 %v1654_v57, %s3350_s5 }
0x24d4   :  { %632 = vrot.lane.b32.xlu0 %v630_v27, %s3350_s5 }
0x2515   :  { %v2179_v63 = vpop.f32.mrb[18].mxu0 }
0x2516   :  { %v2183_v1 = vadd.f32 %v2179_v63, %v2107_v29  ;;  %v2877_v2 = vpop.f32.mrb[19].mxu0 }
0x2518   :  { %3163 = vtanh.f32 %v2183_v1  ;;  %v2604_v8 = vmul.f32 -1.442695, %v2183_v1 }
0x251a   :  { %3165 = vpow2.f32 %v2604_v8  ;;  %v2233_v8 = vld [vmem:[#allocation14 + $0x18] sm:$0xff] }
0x2522   :  { %v3164_v3 = vpop.eup %3163 }
0x2523   :  { %2193 = vrot.lane.b32.xlu1 %v3164_v3, %s3360_s0  ;;  %v2214_v3 = vld [vmem:[#allocation4] sm:$0x3] }
0x2524   :  { %v3166_v10 = vpop.eup %3165 }
0x2525   :  { %v2187_v12 = vadd.f32 1.0, %v3166_v10 }
0x2527   :  { %3167 = vrcp.f32 %v2187_v12 }
0x2531   :  { %v3168_v14 = vpop.eup %3167 }
0x2532   :  { %v2191_v20 = vmul.f32 %v3168_v14, %v2106_v17 }
0x253a   :  { %v1323_v5 = vpop.permute.xlu0 %1322 }
0x253b   :  { %v1325_v24 = vmul.f32 %v3877_v50, %v1323_v5 }
0x253d   :  { %v1332_v56 = vsel %vm1331_vm7, %v1325_v24, 0.0 }
0x253e   :  { %v1990_v7 = vpop.permute.xlu0 %1989 }
0x253f   :  { %1993 = vst.msk [vmem:[#allocation5 + $0x4] sm:$0x3] %vm522_vm4, %v1990_v7 }
0x2542   :  { %v1657_v41 = vpop.permute.xlu0 %1656 }
0x2543   :  { %1660 = vst.msk [vmem:[#allocation5 + $0xa] sm:$0x3] %vm522_vm4, %v1657_v41 }
0x2546   :  { %v633_v9 = vpop.permute.xlu0 %632  ;;  %v2224_v61 = vld [vmem:[#allocation5 + $0x4] sm:$0x3] }
0x2547   :  { %636 = vst.msk [vmem:[#allocation4 + $0x2] sm:$0x3] %vm522_vm4, %v633_v9  ;;  %v2232_v9 = vld [vmem:[#allocation14 + $0x10] sm:$0xff] }
0x254a   :  { %v2227_v59 = vld [vmem:[#allocation5 + $0xa] sm:$0x3] }
0x254e   :  { %v2215_v63 = vld [vmem:[#allocation4 + $0x2] sm:$0x3] }
0x254f   :  { %v2367_v41 = vcombine.low %v2214_v3, %v2215_v63 }
0x2595   :  { %v2194_v15 = vpop.permute.xlu1 %2193 }
0x2596   :  { %v2196_v16 = vmul.f32 %v3168_v14, %v2194_v15 }
0x2598   :  { %2198 = vrot.lane.b32.xlu1 %v2196_v16, %s3350_s5 }
0x260a   :  { %v2199_v22 = vpop.permute.xlu1 %2198 }
0x260b   :  { %v2201_v23 = vadd.f32 %v2199_v22, %v2191_v20  ;;  %v3016_v22 = vpack.c.bf16 %v2233_v8, %v2232_v9 }
0x260d   :  { %3169 = vtanh.f32 %v2201_v23  ;;  %v2375_v23 = vrot.slane %v2367_v41, %v3506_v19 }
0x2617   :  { %v3170_v25 = vpop.eup %3169 }
0x2618   :  { %2204 = vrot.lane.b32.xlu1 %v3170_v25, %s3360_s0 }
0x261c   :  { %1878 = vrot.lane.b32.xlu1 %v1876_v26, %s3350_s5 }
0x2620   :  { %2100 = vrot.lane.b32.xlu1 %v2098_v30, %s3350_s5 }
0x2624   :  { %1545 = vrot.lane.b32.xlu1 %v1543_v28, %s3350_s5 }
0x2628   :  { %1767 = vrot.lane.b32.xlu1 %v1765_v35, %s3350_s5 }
0x262c   :  { %749 = vrot.lane.b32.xlu1 %v747_v45, %s3350_s5 }
0x2630   :  { %983 = vrot.lane.b32.xlu1 %v981_v6, %s3350_s5 }
0x2634   :  { %1217 = vrot.lane.b32.xlu1 %v1215_v13, %s3350_s5 }
0x268a   :  { %v2205_v37 = vpop.permute.xlu1 %2204 }
0x268b   :  { %v2207_v39 = vmul.f32 %v3168_v14, %v2205_v37 }
0x268d   :  { %v2208_v18 = vsel %vm516_vm3, %v2207_v39, 0.0 }
0x268e   :  { %v1879_v21 = vpop.permute.xlu1 %1878  ;;  %2210 = vrot.lane.b32.xlu0 %v2208_v18, %s3350_s5 }
0x268f   :  { %1882 = vst.msk [vmem:[#allocation5 + $0x6] sm:$0x3] %vm522_vm4, %v1879_v21 }
0x2692   :  { %v2101_v47 = vpop.permute.xlu1 %2100  ;;  %866 = vrot.lane.b32.xlu0 %v864_v43, %s3350_s5 }
0x2693   :  { %2104 = vst.msk [vmem:[#allocation5 + $0x2] sm:$0x3] %vm522_vm4, %v2101_v47  ;;  %v3171_v47 = vld [vmem:[#allocation6 + $0x8] sm:$0x3] }
0x2696   :  { %v1546_v51 = vpop.permute.xlu1 %1545  ;;  %1100 = vrot.lane.b32.xlu0 %v1098_v49, %s3350_s5  ;;  %v2225_v55 = vld [vmem:[#allocation5 + $0x6] sm:$0x3] }
0x2697   :  { %1549 = vst.msk [vmem:[#allocation5 + $0xc] sm:$0x3] %vm522_vm4, %v1546_v51  ;;  %v2247_v62 = vcombine.low %v2224_v61, %v2225_v55  ;;  %v3175_v55 = vld [vmem:[#allocation6 + $0x2] sm:$0x3] }
0x2699   :  { %v2261_v7 = vrot.slane %v2247_v62, %v3506_v19  ;;  %v3178_v62 = vld [vmem:[#allocation6 + $0x6] sm:$0x3] }
0x269a   :  { %v1768_v58 = vpop.permute.xlu1 %1767  ;;  %1334 = vrot.lane.b32.xlu0 %v1332_v56, %s3350_s5  ;;  %v2223_v27 = vld [vmem:[#allocation5 + $0x2] sm:$0x3]  ;;  %v3172_v56 = vld [vmem:[#allocation6] sm:$0x3] }
0x269b   :  { %1771 = vst.msk [vmem:[#allocation5 + $0x8] sm:$0x3] %vm522_vm4, %v1768_v58 }
0x269e   :  { %v750_v53 = vpop.permute.xlu1 %749  ;;  %v2228_v60 = vld [vmem:[#allocation5 + $0xc] sm:$0x3] }
0x269f   :  { %753 = vst.msk [vmem:[#allocation4 + $0x4] sm:$0x3] %vm522_vm4, %v750_v53  ;;  %v2264_v29 = vcombine.low %v2228_v60, %v2229_v0  ;;  %v3176_v60 = vld [vmem:[#allocation6 + $0x4] sm:$0x3] }
0x26a1   :  { %v2278_v12 = vrot.slane %v2264_v29, %v3506_v19 }
0x26a2   :  { %v984_v54 = vpop.permute.xlu1 %983  ;;  %v2226_v50 = vld [vmem:[#allocation5 + $0x8] sm:$0x3] }
0x26a3   :  { %987 = vst.msk [vmem:[#allocation4 + $0x8] sm:$0x3] %vm522_vm4, %v984_v54  ;;  %v2263_v52 = vcombine.low %v2226_v50, %v2227_v59  ;;  %v3173_v54 = vld [vmem:[#allocation6 + $0xa] sm:$0x3] }
0x26a5   :  { %v2271_v2 = vrot.slane %v2263_v52, %v3506_v19 }
0x26a6   :  { %v1218_v42 = vpop.permute.xlu1 %1217  ;;  %v2216_v14 = vld [vmem:[#allocation4 + $0x4] sm:$0x3] }
0x26a7   :  { %1221 = vst.msk [vmem:[#allocation4 + $0xc] sm:$0x3] %vm522_vm4, %v1218_v42  ;;  %v2279_v20 = vcombine.low %v2271_v2, %v2278_v12 }
0x26aa   :  { %v2218_v28 = vld [vmem:[#allocation4 + $0x8] sm:$0x3] }
0x26ae   :  { %v2220_v45 = vld [vmem:[#allocation4 + $0xc] sm:$0x3] }
0x2700   :  { %v2211_v48 = vpop.permute.xlu0 %2210 }
0x2701   :  { %2213 = vst.msk [vmem:[#allocation5] sm:$0x3] %vm522_vm4, %v2211_v48  ;;  %v3174_v48 = vld [vmem:[#allocation6 + $0xc] sm:$0x3] }
0x2704   :  { %v867_v44 = vpop.permute.xlu0 %866 }
0x2705   :  { %870 = vst.msk [vmem:[#allocation4 + $0x6] sm:$0x3] %vm522_vm4, %v867_v44 }
0x2708   :  { %v1101_v4 = vpop.permute.xlu0 %1100  ;;  %v2222_v57 = vld [vmem:[#allocation5] sm:$0x3] }
0x2709   :  { %1104 = vst.msk [vmem:[#allocation4 + $0xa] sm:$0x3] %vm522_vm4, %v1101_v4  ;;  %v2246_v1 = vcombine.low %v2222_v57, %v2223_v27 }
0x270b   :  { %v2254_v5 = vrot.slane %v2246_v1, %v3506_v19 }
0x270c   :  { %v1335_v10 = vpop.permute.xlu0 %1334  ;;  %v2217_v15 = vld [vmem:[#allocation4 + $0x6] sm:$0x3] }
0x270d   :  { %1338 = vst.msk [vmem:[#allocation4 + $0xe] sm:$0x3] %vm522_vm4, %v1335_v10  ;;  %v2262_v16 = vcombine.low %v2254_v5, %v2261_v7  ;;  %v2368_v17 = vcombine.low %v2216_v14, %v2217_v15 }
0x270f   :  { %2886 = vmatprep.mubr.msk.f32.mxu1 %vm194_vm1, %v2262_v16  ;;  %v2382_v25 = vrot.slane %v2368_v17, %v3506_v19 }
0x2710   :  { %2887 = vmatmul.mubr.msk.f32.vlgmr.msra.gmra.mrb[16].mxu1 %vm194_vm1, %v2279_v20  ;;  %v2219_v26 = vld [vmem:[#allocation4 + $0xa] sm:$0x3] }
0x2711   :  { %3015 = vmatpush3.bf16.msra.mxu1 %v3012_v46  ;;  %v2383_v30 = vcombine.low %v2375_v23, %v2382_v25  ;;  %v2384_v35 = vcombine.low %v2218_v28, %v2219_v26 }
0x2712   :  { %3017 = vmatprep.subr.bf16.mxu1 %v3016_v22 }
0x2713   :  { %2897 = vmatprep.mubr.msk.f32.mxu1 %vm194_vm1, %v2383_v30  ;;  %v2392_v11 = vrot.slane %v2384_v35, %v3506_v19 }
0x2714   :  { %v2221_v6 = vld [vmem:[#allocation4 + $0xe] sm:$0x3] }
0x2715   :  { %3019 = vmatpush3.bf16.msra.mxu1 %v3016_v22  ;;  %v2385_v13 = vcombine.low %v2220_v45, %v2221_v6 }
0x2717   :  { %v2399_v32 = vrot.slane %v2385_v13, %v3506_v19 }
0x2719   :  { %v2400_v36 = vcombine.low %v2392_v11, %v2399_v32 }
0x271b   :  { %2898 = vmatmul.mubr.msk.f32.vlgmr.msra.gmra.mrb[16].mxu1 %vm194_vm1, %v2400_v36 }
0x27ee   :  { %v2899_v34 = vpop.f32.mrb[16].mxu1 }
0x27ef   :  { %v2488_v37 = vadd.f32 %v2899_v34, %v2609_v31  ;;  %v2471_v38 = vpop.f32.mrb[17].mxu1 }
0x27f0   :  { %v2487_v39 = vadd.f32 %v2609_v31, %v2471_v38 }
0x27f1   :  { %v2508_v18 = vcombine.high %v2488_v37, %v2488_v37  ;;  %v2515_v21 = vrot.slane %v2488_v37, %v3506_v19 }
0x27f2   :  { %v2491_v33 = vcombine.high %v2487_v39, %v2487_v39  ;;  %v2498_v40 = vrot.slane %v2487_v39, %v3506_v19 }
0x27f3   :  { %v2522_v43 = vrot.slane %v2508_v18, %v3506_v19  ;;  %v2523_v46 = vcombine.high %v2515_v21, %v2515_v21  ;;  %v2537_v24 = vadd.f32 %v3171_v47, %v2515_v21 }
0x27f4   :  { %v2505_v49 = vrot.slane %v2491_v33, %v3506_v19  ;;  %v2506_v51 = vcombine.high %v2498_v40, %v2498_v40  ;;  %v2533_v58 = vadd.f32 %v3172_v56, %v2498_v40  ;;  %v3177_v19 = vld [vmem:[#allocation6 + $0xe] sm:$0x3] }
0x27f5   :  { %v2524_v53 = vcombine.high %v2522_v43, %v2522_v43  ;;  %v2538_v42 = vadd.f32 %v3173_v54, %v2523_v46  ;;  %v2539_v50 = vadd.f32 %v3174_v48, %v2522_v43  ;;  %2545 = vst.msk [vmem:[#allocation17 + $0x8] sm:$0x3] %vm522_vm4, %v2537_v24 }
0x27f6   :  { %v2507_v44 = vcombine.high %v2505_v49, %v2505_v49  ;;  %v2534_v59 = vadd.f32 %v3175_v55, %v2506_v51  ;;  %v2535_v61 = vadd.f32 %v3176_v60, %v2505_v49  ;;  %2541 = vst.msk [vmem:[#allocation17] sm:$0x3] %vm522_vm4, %v2533_v58 }
0x27f7   :  { %v2540_v52 = vadd.f32 %v3177_v19, %v2524_v53  ;;  %2546 = vst.msk [vmem:[#allocation17 + $0xa] sm:$0x3] %vm522_vm4, %v2538_v42  ;;  %2547 = vst.msk [vmem:[#allocation17 + $0xc] sm:$0x3] %vm522_vm4, %v2539_v50 }
0x27f8   :  { %v2536_v0 = vadd.f32 %v3178_v62, %v2507_v44  ;;  %2542 = vst.msk [vmem:[#allocation17 + $0x2] sm:$0x3] %vm522_vm4, %v2534_v59  ;;  %2543 = vst.msk [vmem:[#allocation17 + $0x4] sm:$0x3] %vm522_vm4, %v2535_v61 }
0x27f9   :  { %2548 = vst.msk [vmem:[#allocation17 + $0xe] sm:$0x3] %vm522_vm4, %v2540_v52 }
0x27fa   :  { %2544 = vst.msk [vmem:[#allocation17 + $0x6] sm:$0x3] %vm522_vm4, %v2536_v0 }
0x27fb   :  { %3322 = shalt.err (!%p3319_p10)
}
0x27fc   :  { %s3323_s29 = scalar_lea.hbm %s4011_s9, 256 }
0x27fd   :  { %p3324_p11 = scmp.ne.s32.totalorder %s4011_s9, %s3323_s29  ;;  %p3327_p12 = scmp.lt.u32.totalorder %s3323_s29, %s4011_s9 }
0x27ff   :  { %p3329_p13 = pnand %p3327_p12, %p3324_p11 }
0x2801   :  { %3332 = shalt.err (!%p3329_p13)
}
0x2802   :  { %2560 = dma.vmem_to_hbm [thread:$0]  %s2555_s23, 256, %s4011_s9, [#allocation8], %s3350_s5, %s3350_s5, %s3351_s24  }
0x2803   :  { %3341 = dma.done.wait [#allocation8], 256  }
0x2804   :  { %3342 = vsyncadd [#allocation8], 4294967040 }
0x2805   :  { %2564 = vsyncpa [#allocation7], 1 }
0x2806   :  { %2565 = vsyncpa [#allocation10], 1 }
0x2807   :  { %2566 = vsyncpa [#allocation13], 1 }
0x2808   :  { %2567 = vsyncpa [#allocation16], 1 }
0x2809   :  { %2568 = vsyncpa [#allocation8], 1 }

</bundles_post_ra>
